<compile_context>
chip_gen: v7x
topology: tpu7x:2x2x1
jax: 0.10.0
libtpu: 0.0.40
codegen_flags: <defaults>
</compile_context>

<pallas_src>
import numpy as np
import jax
import jax.numpy as jnp
from jax.experimental import pallas as pl
from jax.experimental.pallas import tpu as pltpu


# ----------------------------------------------------------------------------
# Fused kernel
# ----------------------------------------------------------------------------
def _pool2x2_relu(a, b, bias, half):
    """a, b: (rows, 2*half) conv outputs for the even / odd output rows of a
    pooling pair, lanes laid out as [even-col block | odd-col block].
    Returns relu(maxpool2x2(conv) + bias): (rows, half), f32."""
    m = jnp.maximum(jnp.maximum(a[:, :half], a[:, half:]),
                    jnp.maximum(b[:, :half], b[:, half:]))
    return jnp.maximum(m + bias, 0.0)


def _fused_cnn_kernel(xr_ref, t1_ref, b1t_ref, t2_ref, b2t_ref,
                      wfc1_ref, bfc1_ref, wfc2_ref, bfc2_ref, out_ref):
    f32, bf16 = jnp.float32, jnp.bfloat16
    bt = out_ref.shape[1]          # images per grid step
    r2 = 4 * bt                    # conv2 rows per output-row parity

    # ---- conv1 (1->16, 5x5, VALID): one K=140 matmul per output-row group.
    # xr_ref[0, g] row p*bt + b  ->  image b, conv output row ho = 4p + g,
    # holding input rows [ho, ho+5) flattened (5*28 = 140 columns).
    # Output lane = 256*(wo%2) + (wo//2)*16 + co, so 2x2 pooling over columns
    # is an aligned 256-lane split (lanes 192..255 of each pooled half are
    # zero padding; conv2's weight rows there are zero-packed too).
    t1 = t1_ref[...]
    b1t = b1t_ref[...]
    h1 = []                        # h1[par] row p*bt + b -> pooled row 2p+par
    for g in (0, 2):
        even = jnp.dot(xr_ref[0, g], t1, preferred_element_type=f32)
        odd = jnp.dot(xr_ref[0, g + 1], t1, preferred_element_type=f32)
        h1.append(_pool2x2_relu(even, odd, b1t, 256))        # (6*bt, 256) f32

    # ---- conv2 (16->32, 5x5, VALID): the 5 ky taps fused along K by
    # concatenating 5 contiguous row-slices of h1 along lanes -> (4*bt, 1280).
    t2 = t2_ref[...]

    def conv2(par):                # output rows: p*bt + b  ->  ho2 = 2p + par
        parts = []
        for ky in range(5):
            s = par + ky
            off = (s // 2) * bt
            parts.append(h1[s % 2][off:off + r2, :])
        lhs = jnp.concatenate(parts, axis=1).astype(bf16)    # (4*bt, 1280)
        return jnp.dot(lhs, t2, preferred_element_type=f32)  # (4*bt, 256)

    # maxpool(2) + bias + relu -> h2: (4*bt, 128), row q*bt+b -> image b,
    # pooled row ph2 = q, lane = pw2*32 + co2.
    h2 = _pool2x2_relu(conv2(0), conv2(1), b2t_ref[...], 128)

    # ---- fc1 (512 -> 256) + relu.  The PyTorch NCHW flatten permutation is
    # folded into wfc1_ref; the (bt, 512) LHS is 4 aligned lane-concats.
    lhs_fc1 = jnp.concatenate(
        [h2[q * bt:(q + 1) * bt, :] for q in range(4)], axis=1).astype(bf16)
    h3 = jnp.maximum(
        jnp.dot(lhs_fc1, wfc1_ref[...], preferred_element_type=f32)
        + bfc1_ref[...], 0.0).astype(bf16)                   # (bt, 256)

    # ---- fc2 (256 -> 10), padded to 128 output lanes (lane-dense store).
    h4 = jnp.dot(h3, wfc2_ref[...], preferred_element_type=f32) + bfc2_ref[...]
    out_ref[0] = h4.astype(out_ref.dtype)                    # (bt, 128)


# ----------------------------------------------------------------------------
# Wrapper
# ----------------------------------------------------------------------------
def _round_up(n, m):
    return ((n + m - 1) // m) * m


def model_cnn_forward(x_nchw, fused, *, bt_target=40):
    """x_nchw: (B, 1, 28, 28).  fused: output of prepare_fused_params()."""
    B = x_nchw.shape[0]
    # BT: multiple of 8 (keeps all in-kernel row slices sublane-aligned);
    # ~40 fills the 256-row MXU on v6e/v7x (conv1 M = 240).
    bt = min(_round_up(bt_target, 8), _round_up(B, 8))
    Bp = _round_up(B, bt)
    nb = Bp // bt

    x = x_nchw.reshape(B, 28, 28).astype(jnp.float32)
    if Bp != B:
        x = jnp.concatenate([x, jnp.zeros((Bp - B, 28, 28), x.dtype)], axis=0)

    # im2row along height: xw[b, ho, :] = x[b, ho:ho+5, :].reshape(140)
    ridx = jnp.arange(24)[:, None] + jnp.arange(5)[None, :]        # (24, 5)
    xw = x[:, ridx, :].reshape(Bp, 24, 140)
    # group conv output rows by ho % 4 (ho = 4p + g) ...
    xw = xw.reshape(Bp, 6, 4, 140).transpose(0, 2, 1, 3)           # (Bp,4,6,140)
    # ... and pack bt images per grid step in p-major / image-minor row order
    # (row = p*bt + b) so the conv2 LHS slices in the kernel are contiguous.
    xw = (xw.reshape(nb, bt, 4, 6, 140)
            .transpose(0, 2, 3, 1, 4)
            .reshape(nb, 4, 6 * bt, 140)
            .astype(jnp.bfloat16))

    out = pl.pallas_call(
        _fused_cnn_kernel,
        out_shape=jax.ShapeDtypeStruct((nb, bt, 128), jnp.float32),
        grid=(nb,),
        in_specs=[
            pl.BlockSpec((1, 4, 6 * bt, 140), lambda i: (i, 0, 0, 0)),  # input
            pl.BlockSpec((140, 512), lambda i: (0, 0)),     # conv1 weight (K-fused)
            pl.BlockSpec((1, 256), lambda i: (0, 0)),       # conv1 bias (tiled)
            pl.BlockSpec((1280, 256), lambda i: (0, 0)),    # conv2 weight (K-fused)
            pl.BlockSpec((1, 128), lambda i: (0, 0)),       # conv2 bias (tiled)
            pl.BlockSpec((512, 256), lambda i: (0, 0)),     # fc1 weight (permuted)
            pl.BlockSpec((1, 256), lambda i: (0, 0)),       # fc1 bias
            pl.BlockSpec((256, 128), lambda i: (0, 0)),     # fc2 weight (padded)
            pl.BlockSpec((1, 128), lambda i: (0, 0)),       # fc2 bias (padded)
        ],
        out_specs=pl.BlockSpec((1, bt, 128), lambda i: (i, 0, 0)),
        compiler_params=pltpu.CompilerParams(
            dimension_semantics=("parallel",),
            vmem_limit_bytes=32 * 1024 * 1024),
    )(xw, fused["t1k"], fused["b1t"], fused["t2k"], fused["b2t"],
      fused["wfc1k"], fused["bfc1"], fused["wfc2p"], fused["bfc2"])

    return out.reshape(Bp, 128)[:B, :10]


# ----------------------------------------------------------------------------
# One-time weight repacking (host-side, amortized across forward calls)
# ----------------------------------------------------------------------------
def prepare_fused_params(params, weight_dtype=jnp.bfloat16):
    w1 = np.asarray(params["w1"], np.float32)       # (5, 5, 1, 16)  HWIO
    b1 = np.asarray(params["b1"], np.float32)       # (16,)
    w2 = np.asarray(params["w2"], np.float32)       # (5, 5, 16, 32) HWIO
    b2 = np.asarray(params["b2"], np.float32)       # (32,)
    wfc1 = np.asarray(params["wfc1"], np.float32)   # (512, 256), rows = NCHW idx
    bfc1 = np.asarray(params["bfc1"], np.float32)   # (256,)
    wfc2 = np.asarray(params["wfc2"], np.float32)   # (256, 10)
    bfc2 = np.asarray(params["bfc2"], np.float32)   # (10,)

    # conv1 Toeplitz weight, 5 ky taps fused along K (K = 5*28 = 140):
    #   t1k[ky*28 + j, 256*(wo%2) + (wo//2)*16 + co] = w1[ky, j - wo, 0, co]
    t1 = np.zeros((5, 28, 512), np.float32)
    for ky in range(5):
        for wo in range(24):
            base = 256 * (wo % 2) + (wo // 2) * 16
            for kx in range(5):
                t1[ky, wo + kx, base:base + 16] = w1[ky, kx, 0, :]
    # pooled-h1 pad lanes 192..255 must stay exactly zero (conv2 relies on it)
    assert np.all(t1[:, :, 192:256] == 0.0) and np.all(t1[:, :, 448:512] == 0.0)
    t1k = t1.reshape(140, 512)

    b1t = np.zeros((1, 256), np.float32)
    for pw in range(12):
        b1t[0, pw * 16: pw * 16 + 16] = b1

    # conv2 Toeplitz weight, 5 ky taps fused along K (K = 5*256 = 1280):
    #   input lane = ky*256 + pw*16 + ci, output lane = 128*(wo2%2)+(wo2//2)*32+co2
    t2 = np.zeros((5, 256, 256), np.float32)
    for ky in range(5):
        for wo in range(8):
            base = 128 * (wo % 2) + (wo // 2) * 32
            for kx in range(5):
                pw = wo + kx
                t2[ky, pw * 16: pw * 16 + 16, base:base + 32] = w2[ky, kx]
    # weight rows lining up with h1's zero pad lanes must be zero-packed
    assert np.all(t2[:, 192:256, :] == 0.0)
    t2k = t2.reshape(1280, 256)

    b2t = np.zeros((1, 128), np.float32)
    for pw in range(4):
        b2t[0, pw * 32: pw * 32 + 32] = b2

    # fc1 with the PyTorch NCHW flatten permutation folded in; kernel LHS lane
    # layout is ph2*128 + pw2*32 + co2.
    wfc1k = np.zeros((512, 256), np.float32)
    for ph in range(4):
        for pw in range(4):
            for co in range(32):
                wfc1k[ph * 128 + pw * 32 + co, :] = wfc1[co * 16 + ph * 4 + pw, :]

    # fc2 padded to 128 output lanes (lane-dense output stores)
    wfc2p = np.zeros((256, 128), np.float32)
    wfc2p[:, :10] = wfc2
    bfc2p = np.zeros((1, 128), np.float32)
    bfc2p[0, :10] = bfc2

    return {
        "t1k": jnp.asarray(t1k, weight_dtype),
        "b1t": jnp.asarray(b1t, jnp.float32),
        "t2k": jnp.asarray(t2k, weight_dtype),
        "b2t": jnp.asarray(b2t, jnp.float32),
        "wfc1k": jnp.asarray(wfc1k, weight_dtype),
        "bfc1": jnp.asarray(bfc1.reshape(1, 256), jnp.float32),
        "wfc2p": jnp.asarray(wfc2p, weight_dtype),
        "bfc2": jnp.asarray(bfc2p, jnp.float32),
    }


# ----------------------------------------------------------------------------
# Params + pure-JAX (f32) reference
# ----------------------------------------------------------------------------
def init_params(key):
    ks = jax.random.split(key, 8)
    s = 0.05
    return {
        "w1": jax.random.normal(ks[0], (5, 5, 1, 16)) * s,
        "b1": jax.random.normal(ks[1], (16,)) * s,
        "w2": jax.random.normal(ks[2], (5, 5, 16, 32)) * s,
        "b2": jax.random.normal(ks[3], (32,)) * s,
        "wfc1": jax.random.normal(ks[4], (512, 256)) * s,   # (in, out), in = NCHW flat
        "bfc1": jax.random.normal(ks[5], (256,)) * s,
        "wfc2": jax.random.normal(ks[6], (256, 10)) * s,
        "bfc2": jax.random.normal(ks[7], (10,)) * s,
    }


def model_cnn_reference(x_nchw, params):
    B = x_nchw.shape[0]
    x = jnp.transpose(x_nchw, (0, 2, 3, 1)).astype(jnp.float32)   # NHWC

    def conv(x, w, b):
        y = jax.lax.conv_general_dilated(
            x, w, (1, 1), "VALID", dimension_numbers=("NHWC", "HWIO", "NHWC"))
        return y + b

    def pool_relu(y):
        y = jax.lax.reduce_window(y, -jnp.inf, jax.lax.max,
                                  (1, 2, 2, 1), (1, 2, 2, 1), "VALID")
        return jnp.maximum(y, 0.0)

    h1 = pool_relu(conv(x, params["w1"], params["b1"]))
    h2 = pool_relu(conv(h1, params["w2"], params["b2"]))
    h2f = jnp.transpose(h2, (0, 3, 1, 2)).reshape(B, 512)
    h3 = jnp.maximum(h2f @ params["wfc1"] + params["bfc1"], 0.0)
    return h3 @ params["wfc2"] + params["bfc2"]


if __name__ == "__main__":
    key = jax.random.PRNGKey(0)
    k_in, k_in2, k_par = jax.random.split(key, 3)
    params = init_params(k_par)
    fused = prepare_fused_params(params)     # one-time weight repack (bf16)

    fwd = jax.jit(model_cnn_forward)

    # Small batch (pads up to BT=8, grid=1).
    x = jax.random.normal(k_in, (2, 1, 28, 28), dtype=jnp.float32)   # NCHW
    out = jax.block_until_ready(fwd(x, fused))
    ref = jax.block_until_ready(model_cnn_reference(x, params))
    assert out.shape == (2, 10), out.shape
    # bf16 MXU inputs (f32 accumulation) vs. the f32 reference -> relaxed tol.
    err = float(jnp.max(jnp.abs(out - ref)))
    assert err < 5e-2, err

    # Larger batch exercises the batched path: BT=40, padded to 120, grid=3.
    x2 = jax.random.normal(k_in2, (96, 1, 28, 28), dtype=jnp.float32)
    out2 = jax.block_until_ready(fwd(x2, fused))
    ref2 = jax.block_until_ready(model_cnn_reference(x2, params))
    assert out2.shape == (96, 10), out2.shape
    err2 = float(jnp.max(jnp.abs(out2 - ref2)))
    assert err2 < 5e-2, err2

    print("KERNEL_OK")
</pallas_src>

<mosaic_0001>
module attributes {stable_mosaic.version = 11 : i64} {
  func.func @_fused_cnn_kernel(%arg0: i32, %arg1: memref<1x4x48x140xbf16, #tpu.memory_space<vmem>>, %arg2: memref<140x512xbf16, #tpu.memory_space<vmem>>, %arg3: memref<1x256xf32, #tpu.memory_space<vmem>>, %arg4: memref<1280x256xbf16, #tpu.memory_space<vmem>>, %arg5: memref<1x128xf32, #tpu.memory_space<vmem>>, %arg6: memref<512x256xbf16, #tpu.memory_space<vmem>>, %arg7: memref<1x256xf32, #tpu.memory_space<vmem>>, %arg8: memref<256x128xbf16, #tpu.memory_space<vmem>>, %arg9: memref<1x128xf32, #tpu.memory_space<vmem>>, %arg10: memref<1x8x128xf32, #tpu.memory_space<vmem>>) attributes {dimension_semantics = [#tpu.dimension_semantics<parallel>], iteration_bounds = array<i64: 1>, scalar_prefetch = 0 : i64, scratch_operands = 0 : i64, tpu.core_type = #tpu.core_type<tc>, window_params = [{transform_indices = @transform_0, window_bounds = array<i64: 1, 4, 48, 140>}, {pipeline_mode = #tpu.pipeline_mode<synchronous>, transform_indices = @transform_1, window_bounds = array<i64: 140, 512>}, {pipeline_mode = #tpu.pipeline_mode<synchronous>, transform_indices = @transform_2, window_bounds = array<i64: 1, 256>}, {pipeline_mode = #tpu.pipeline_mode<synchronous>, transform_indices = @transform_3, window_bounds = array<i64: 1280, 256>}, {pipeline_mode = #tpu.pipeline_mode<synchronous>, transform_indices = @transform_4, window_bounds = array<i64: 1, 128>}, {pipeline_mode = #tpu.pipeline_mode<synchronous>, transform_indices = @transform_5, window_bounds = array<i64: 512, 256>}, {pipeline_mode = #tpu.pipeline_mode<synchronous>, transform_indices = @transform_6, window_bounds = array<i64: 1, 256>}, {pipeline_mode = #tpu.pipeline_mode<synchronous>, transform_indices = @transform_7, window_bounds = array<i64: 256, 128>}, {pipeline_mode = #tpu.pipeline_mode<synchronous>, transform_indices = @transform_8, window_bounds = array<i64: 1, 128>}, {transform_indices = @transform_9, window_bounds = array<i64: 1, 8, 128>}]} {
    %c0 = arith.constant 0 : index
    %c0_0 = arith.constant 0 : index
    %0 = vector.load %arg2[%c0, %c0_0] : memref<140x512xbf16, #tpu.memory_space<vmem>>, vector<140x512xbf16>
    %c0_1 = arith.constant 0 : index
    %c0_2 = arith.constant 0 : index
    %1 = vector.load %arg3[%c0_1, %c0_2] : memref<1x256xf32, #tpu.memory_space<vmem>>, vector<1x256xf32>
    %c0_3 = arith.constant 0 : index
    %c0_4 = arith.constant 0 : index
    %c0_5 = arith.constant 0 : index
    %c0_6 = arith.constant 0 : index
    %2 = vector.load %arg1[%c0_3, %c0_4, %c0_5, %c0_6] : memref<1x4x48x140xbf16, #tpu.memory_space<vmem>>, vector<1x1x48x140xbf16>
    %3 = vector.shape_cast %2 : vector<1x1x48x140xbf16> to vector<48x140xbf16>
    %cst = arith.constant dense<0.000000e+00> : vector<48x512xf32>
    %4 = tpu.matmul %3, %0, %cst {dimension_numbers = #tpu.dot_dimension_numbers<[1], [0], [0], [1], [0, 0, 1, 1], [], []>} : vector<48x140xbf16>, vector<140x512xbf16>, vector<48x512xf32> -> vector<48x512xf32>
    %c0_7 = arith.constant 0 : index
    %c1 = arith.constant 1 : index
    %c0_8 = arith.constant 0 : index
    %c0_9 = arith.constant 0 : index
    %5 = vector.load %arg1[%c0_7, %c1, %c0_8, %c0_9] : memref<1x4x48x140xbf16, #tpu.memory_space<vmem>>, vector<1x1x48x140xbf16>
    %6 = vector.shape_cast %5 : vector<1x1x48x140xbf16> to vector<48x140xbf16>
    %cst_10 = arith.constant dense<0.000000e+00> : vector<48x512xf32>
    %7 = tpu.matmul %6, %0, %cst_10 {dimension_numbers = #tpu.dot_dimension_numbers<[1], [0], [0], [1], [0, 0, 1, 1], [], []>} : vector<48x140xbf16>, vector<140x512xbf16>, vector<48x512xf32> -> vector<48x512xf32>
    %8 = vector.extract_strided_slice %4 {offsets = [0, 0], sizes = [48, 256], strides = [1, 1]} : vector<48x512xf32> to vector<48x256xf32>
    %9 = vector.extract_strided_slice %4 {offsets = [0, 256], sizes = [48, 256], strides = [1, 1]} : vector<48x512xf32> to vector<48x256xf32>
    %10 = arith.maximumf %8, %9 : vector<48x256xf32>
    %11 = vector.extract_strided_slice %7 {offsets = [0, 0], sizes = [48, 256], strides = [1, 1]} : vector<48x512xf32> to vector<48x256xf32>
    %12 = vector.extract_strided_slice %7 {offsets = [0, 256], sizes = [48, 256], strides = [1, 1]} : vector<48x512xf32> to vector<48x256xf32>
    %13 = arith.maximumf %11, %12 : vector<48x256xf32>
    %14 = arith.maximumf %10, %13 : vector<48x256xf32>
    %15 = vector.broadcast %1 : vector<1x256xf32> to vector<48x256xf32>
    %16 = arith.addf %14, %15 : vector<48x256xf32>
    %cst_11 = arith.constant 0.000000e+00 : f32
    %17 = vector.broadcast %cst_11 : f32 to vector<48x256xf32>
    %18 = arith.maximumf %16, %17 : vector<48x256xf32>
    %c0_12 = arith.constant 0 : index
    %c2 = arith.constant 2 : index
    %c0_13 = arith.constant 0 : index
    %c0_14 = arith.constant 0 : index
    %19 = vector.load %arg1[%c0_12, %c2, %c0_13, %c0_14] : memref<1x4x48x140xbf16, #tpu.memory_space<vmem>>, vector<1x1x48x140xbf16>
    %20 = vector.shape_cast %19 : vector<1x1x48x140xbf16> to vector<48x140xbf16>
    %cst_15 = arith.constant dense<0.000000e+00> : vector<48x512xf32>
    %21 = tpu.matmul %20, %0, %cst_15 {dimension_numbers = #tpu.dot_dimension_numbers<[1], [0], [0], [1], [0, 0, 1, 1], [], []>} : vector<48x140xbf16>, vector<140x512xbf16>, vector<48x512xf32> -> vector<48x512xf32>
    %c0_16 = arith.constant 0 : index
    %c3 = arith.constant 3 : index
    %c0_17 = arith.constant 0 : index
    %c0_18 = arith.constant 0 : index
    %22 = vector.load %arg1[%c0_16, %c3, %c0_17, %c0_18] : memref<1x4x48x140xbf16, #tpu.memory_space<vmem>>, vector<1x1x48x140xbf16>
    %23 = vector.shape_cast %22 : vector<1x1x48x140xbf16> to vector<48x140xbf16>
    %cst_19 = arith.constant dense<0.000000e+00> : vector<48x512xf32>
    %24 = tpu.matmul %23, %0, %cst_19 {dimension_numbers = #tpu.dot_dimension_numbers<[1], [0], [0], [1], [0, 0, 1, 1], [], []>} : vector<48x140xbf16>, vector<140x512xbf16>, vector<48x512xf32> -> vector<48x512xf32>
    %25 = vector.extract_strided_slice %21 {offsets = [0, 0], sizes = [48, 256], strides = [1, 1]} : vector<48x512xf32> to vector<48x256xf32>
    %26 = vector.extract_strided_slice %21 {offsets = [0, 256], sizes = [48, 256], strides = [1, 1]} : vector<48x512xf32> to vector<48x256xf32>
    %27 = arith.maximumf %25, %26 : vector<48x256xf32>
    %28 = vector.extract_strided_slice %24 {offsets = [0, 0], sizes = [48, 256], strides = [1, 1]} : vector<48x512xf32> to vector<48x256xf32>
    %29 = vector.extract_strided_slice %24 {offsets = [0, 256], sizes = [48, 256], strides = [1, 1]} : vector<48x512xf32> to vector<48x256xf32>
    %30 = arith.maximumf %28, %29 : vector<48x256xf32>
    %31 = arith.maximumf %27, %30 : vector<48x256xf32>
    %32 = vector.broadcast %1 : vector<1x256xf32> to vector<48x256xf32>
    %33 = arith.addf %31, %32 : vector<48x256xf32>
    %cst_20 = arith.constant 0.000000e+00 : f32
    %34 = vector.broadcast %cst_20 : f32 to vector<48x256xf32>
    %35 = arith.maximumf %33, %34 : vector<48x256xf32>
    %c0_21 = arith.constant 0 : index
    %c0_22 = arith.constant 0 : index
    %36 = vector.load %arg4[%c0_21, %c0_22] : memref<1280x256xbf16, #tpu.memory_space<vmem>>, vector<1280x256xbf16>
    %37 = vector.extract_strided_slice %18 {offsets = [0, 0], sizes = [32, 256], strides = [1, 1]} : vector<48x256xf32> to vector<32x256xf32>
    %38 = vector.extract_strided_slice %35 {offsets = [0, 0], sizes = [32, 256], strides = [1, 1]} : vector<48x256xf32> to vector<32x256xf32>
    %39 = vector.extract_strided_slice %18 {offsets = [8, 0], sizes = [32, 256], strides = [1, 1]} : vector<48x256xf32> to vector<32x256xf32>
    %40 = vector.extract_strided_slice %35 {offsets = [8, 0], sizes = [32, 256], strides = [1, 1]} : vector<48x256xf32> to vector<32x256xf32>
    %41 = vector.extract_strided_slice %18 {offsets = [16, 0], sizes = [32, 256], strides = [1, 1]} : vector<48x256xf32> to vector<32x256xf32>
    %42 = tpu.concatenate %37, %38, %39, %40, %41 in 1 : vector<32x256xf32>, vector<32x256xf32>, vector<32x256xf32>, vector<32x256xf32>, vector<32x256xf32> -> vector<32x1280xf32>
    %43 = arith.truncf %42 : vector<32x1280xf32> to vector<32x1280xbf16>
    %cst_23 = arith.constant dense<0.000000e+00> : vector<32x256xf32>
    %44 = tpu.matmul %43, %36, %cst_23 {dimension_numbers = #tpu.dot_dimension_numbers<[1], [0], [0], [1], [0, 0, 1, 1], [], []>} : vector<32x1280xbf16>, vector<1280x256xbf16>, vector<32x256xf32> -> vector<32x256xf32>
    %45 = vector.extract_strided_slice %35 {offsets = [0, 0], sizes = [32, 256], strides = [1, 1]} : vector<48x256xf32> to vector<32x256xf32>
    %46 = vector.extract_strided_slice %18 {offsets = [8, 0], sizes = [32, 256], strides = [1, 1]} : vector<48x256xf32> to vector<32x256xf32>
    %47 = vector.extract_strided_slice %35 {offsets = [8, 0], sizes = [32, 256], strides = [1, 1]} : vector<48x256xf32> to vector<32x256xf32>
    %48 = vector.extract_strided_slice %18 {offsets = [16, 0], sizes = [32, 256], strides = [1, 1]} : vector<48x256xf32> to vector<32x256xf32>
    %49 = vector.extract_strided_slice %35 {offsets = [16, 0], sizes = [32, 256], strides = [1, 1]} : vector<48x256xf32> to vector<32x256xf32>
    %50 = tpu.concatenate %45, %46, %47, %48, %49 in 1 : vector<32x256xf32>, vector<32x256xf32>, vector<32x256xf32>, vector<32x256xf32>, vector<32x256xf32> -> vector<32x1280xf32>
    %51 = arith.truncf %50 : vector<32x1280xf32> to vector<32x1280xbf16>
    %cst_24 = arith.constant dense<0.000000e+00> : vector<32x256xf32>
    %52 = tpu.matmul %51, %36, %cst_24 {dimension_numbers = #tpu.dot_dimension_numbers<[1], [0], [0], [1], [0, 0, 1, 1], [], []>} : vector<32x1280xbf16>, vector<1280x256xbf16>, vector<32x256xf32> -> vector<32x256xf32>
    %c0_25 = arith.constant 0 : index
    %c0_26 = arith.constant 0 : index
    %53 = vector.load %arg5[%c0_25, %c0_26] : memref<1x128xf32, #tpu.memory_space<vmem>>, vector<1x128xf32>
    %54 = vector.extract_strided_slice %44 {offsets = [0, 0], sizes = [32, 128], strides = [1, 1]} : vector<32x256xf32> to vector<32x128xf32>
    %55 = vector.extract_strided_slice %44 {offsets = [0, 128], sizes = [32, 128], strides = [1, 1]} : vector<32x256xf32> to vector<32x128xf32>
    %56 = arith.maximumf %54, %55 : vector<32x128xf32>
    %57 = vector.extract_strided_slice %52 {offsets = [0, 0], sizes = [32, 128], strides = [1, 1]} : vector<32x256xf32> to vector<32x128xf32>
    %58 = vector.extract_strided_slice %52 {offsets = [0, 128], sizes = [32, 128], strides = [1, 1]} : vector<32x256xf32> to vector<32x128xf32>
    %59 = arith.maximumf %57, %58 : vector<32x128xf32>
    %60 = arith.maximumf %56, %59 : vector<32x128xf32>
    %61 = vector.broadcast %53 : vector<1x128xf32> to vector<32x128xf32>
    %62 = arith.addf %60, %61 : vector<32x128xf32>
    %cst_27 = arith.constant 0.000000e+00 : f32
    %63 = vector.broadcast %cst_27 : f32 to vector<32x128xf32>
    %64 = arith.maximumf %62, %63 : vector<32x128xf32>
    %65 = vector.extract_strided_slice %64 {offsets = [0, 0], sizes = [8, 128], strides = [1, 1]} : vector<32x128xf32> to vector<8x128xf32>
    %66 = vector.extract_strided_slice %64 {offsets = [8, 0], sizes = [8, 128], strides = [1, 1]} : vector<32x128xf32> to vector<8x128xf32>
    %67 = vector.extract_strided_slice %64 {offsets = [16, 0], sizes = [8, 128], strides = [1, 1]} : vector<32x128xf32> to vector<8x128xf32>
    %68 = vector.extract_strided_slice %64 {offsets = [24, 0], sizes = [8, 128], strides = [1, 1]} : vector<32x128xf32> to vector<8x128xf32>
    %69 = tpu.concatenate %65, %66, %67, %68 in 1 : vector<8x128xf32>, vector<8x128xf32>, vector<8x128xf32>, vector<8x128xf32> -> vector<8x512xf32>
    %70 = arith.truncf %69 : vector<8x512xf32> to vector<8x512xbf16>
    %c0_28 = arith.constant 0 : index
    %c0_29 = arith.constant 0 : index
    %71 = vector.load %arg6[%c0_28, %c0_29] : memref<512x256xbf16, #tpu.memory_space<vmem>>, vector<512x256xbf16>
    %cst_30 = arith.constant dense<0.000000e+00> : vector<8x256xf32>
    %72 = tpu.matmul %70, %71, %cst_30 {dimension_numbers = #tpu.dot_dimension_numbers<[1], [0], [0], [1], [0, 0, 1, 1], [], []>} : vector<8x512xbf16>, vector<512x256xbf16>, vector<8x256xf32> -> vector<8x256xf32>
    %c0_31 = arith.constant 0 : index
    %c0_32 = arith.constant 0 : index
    %73 = vector.load %arg7[%c0_31, %c0_32] : memref<1x256xf32, #tpu.memory_space<vmem>>, vector<1x256xf32>
    %74 = vector.broadcast %73 : vector<1x256xf32> to vector<8x256xf32>
    %75 = arith.addf %72, %74 : vector<8x256xf32>
    %cst_33 = arith.constant 0.000000e+00 : f32
    %76 = vector.broadcast %cst_33 : f32 to vector<8x256xf32>
    %77 = arith.maximumf %75, %76 : vector<8x256xf32>
    %78 = arith.truncf %77 : vector<8x256xf32> to vector<8x256xbf16>
    %c0_34 = arith.constant 0 : index
    %c0_35 = arith.constant 0 : index
    %79 = vector.load %arg8[%c0_34, %c0_35] : memref<256x128xbf16, #tpu.memory_space<vmem>>, vector<256x128xbf16>
    %cst_36 = arith.constant dense<0.000000e+00> : vector<8x128xf32>
    %80 = tpu.matmul %78, %79, %cst_36 {dimension_numbers = #tpu.dot_dimension_numbers<[1], [0], [0], [1], [0, 0, 1, 1], [], []>} : vector<8x256xbf16>, vector<256x128xbf16>, vector<8x128xf32> -> vector<8x128xf32>
    %c0_37 = arith.constant 0 : index
    %c0_38 = arith.constant 0 : index
    %81 = vector.load %arg9[%c0_37, %c0_38] : memref<1x128xf32, #tpu.memory_space<vmem>>, vector<1x128xf32>
    %82 = vector.broadcast %81 : vector<1x128xf32> to vector<8x128xf32>
    %83 = arith.addf %80, %82 : vector<8x128xf32>
    %c0_39 = arith.constant 0 : index
    %c0_40 = arith.constant 0 : index
    %c0_41 = arith.constant 0 : index
    %84 = vector.load %arg10[%c0_39, %c0_40, %c0_41] : memref<1x8x128xf32, #tpu.memory_space<vmem>>, vector<1x8x128xf32>
    %85 = vector.shape_cast %84 : vector<1x8x128xf32> to vector<8x128xf32>
    %86 = vector.shape_cast %83 : vector<8x128xf32> to vector<1x8x128xf32>
    tpu.vector_store %arg10[%c0_39, %c0_40, %c0_41], %86 {strides = array<i32>} : memref<1x8x128xf32, #tpu.memory_space<vmem>>, vector<1x8x128xf32>,
    return
  }
  func.func @transform_0(%arg0: i32) -> (i32, i32, i32, i32) {
    %c0_i32 = arith.constant 0 : i32
    %c0_i32_0 = arith.constant 0 : i32
    %c0_i32_1 = arith.constant 0 : i32
    %c0_i32_2 = arith.constant 0 : i32
    return %arg0, %c0_i32, %c0_i32_0, %c0_i32_1 : i32, i32, i32, i32
  }
  func.func @transform_1(%arg0: i32) -> (i32, i32) {
    %c0_i32 = arith.constant 0 : i32
    %c0_i32_0 = arith.constant 0 : i32
    %c0_i32_1 = arith.constant 0 : i32
    return %c0_i32, %c0_i32_0 : i32, i32
  }
  func.func @transform_2(%arg0: i32) -> (i32, i32) {
    %c0_i32 = arith.constant 0 : i32
    %c0_i32_0 = arith.constant 0 : i32
    %c0_i32_1 = arith.constant 0 : i32
    return %c0_i32, %c0_i32_0 : i32, i32
  }
  func.func @transform_3(%arg0: i32) -> (i32, i32) {
    %c0_i32 = arith.constant 0 : i32
    %c0_i32_0 = arith.constant 0 : i32
    %c0_i32_1 = arith.constant 0 : i32
    return %c0_i32, %c0_i32_0 : i32, i32
  }
  func.func @transform_4(%arg0: i32) -> (i32, i32) {
    %c0_i32 = arith.constant 0 : i32
    %c0_i32_0 = arith.constant 0 : i32
    %c0_i32_1 = arith.constant 0 : i32
    return %c0_i32, %c0_i32_0 : i32, i32
  }
  func.func @transform_5(%arg0: i32) -> (i32, i32) {
    %c0_i32 = arith.constant 0 : i32
    %c0_i32_0 = arith.constant 0 : i32
    %c0_i32_1 = arith.constant 0 : i32
    return %c0_i32, %c0_i32_0 : i32, i32
  }
  func.func @transform_6(%arg0: i32) -> (i32, i32) {
    %c0_i32 = arith.constant 0 : i32
    %c0_i32_0 = arith.constant 0 : i32
    %c0_i32_1 = arith.constant 0 : i32
    return %c0_i32, %c0_i32_0 : i32, i32
  }
  func.func @transform_7(%arg0: i32) -> (i32, i32) {
    %c0_i32 = arith.constant 0 : i32
    %c0_i32_0 = arith.constant 0 : i32
    %c0_i32_1 = arith.constant 0 : i32
    return %c0_i32, %c0_i32_0 : i32, i32
  }
  func.func @transform_8(%arg0: i32) -> (i32, i32) {
    %c0_i32 = arith.constant 0 : i32
    %c0_i32_0 = arith.constant 0 : i32
    %c0_i32_1 = arith.constant 0 : i32
    return %c0_i32, %c0_i32_0 : i32, i32
  }
  func.func @transform_9(%arg0: i32) -> (i32, i32, i32) {
    %c0_i32 = arith.constant 0 : i32
    %c0_i32_0 = arith.constant 0 : i32
    %c0_i32_1 = arith.constant 0 : i32
    return %arg0, %c0_i32, %c0_i32_0 : i32, i32, i32
  }
}

</mosaic_0001>

<bundles_post_ra>
// kernel: model_cnn_forward.1
= control target key start
LH: loop header
LB: loop body
LE: loop exit
PB: predicated region body
PF: predicated region fallthrough
CT: control target
= control target key end

     0   :  { %vm279_vm0 = vcmask 97280   ;;  %vm289_vm1 = vcmask 1045504   ;;  %s6352_s1 = inlined_call_operand.vmem [shape: bf16[140,512], index: 1, kind: input, shape index: {}]   ;;  %s6353_s0 = inlined_call_operand.vmem [shape: bf16[1,4,48,140], index: 0, kind: input, shape index: {}]   ;;  %s6354_s3 = inlined_call_operand.vmem [shape: bf16[1280,256], index: 3, kind: input, shape index: {}]   ;;  %s6355_s2 = inlined_call_operand.vmem [shape: f32[1,256], index: 2, kind: input, shape index: {}]   ;;  %s6356_s5 = inlined_call_operand.vmem [shape: bf16[512,256], index: 5, kind: input, shape index: {}]   ;;  %s6357_s7 = inlined_call_operand.vmem [shape: bf16[256,128], index: 7, kind: input, shape index: {}]   ;;  %s6358_s4 = inlined_call_operand.vmem [shape: f32[1,128], index: 4, kind: input, shape index: {}]   ;;  %s6359_s6 = inlined_call_operand.vmem [shape: f32[1,256], index: 6, kind: input, shape index: {}]   ;;  %s6360_s8 = inlined_call_operand.vmem [shape: f32[1,128], index: 8, kind: input, shape index: {}]   ;;  %s6361_s9 = inlined_call_operand.vmem [shape: f32[1,8,128], index: 9, kind: output, shape index: {}]  }
   0x1   :  { %v4208_v0 = vld [vmem:[%s6352_s1 + $0x4] ss:$16 sps:$4 sm:$0xff]   ;;  %v4213_v1 = vld [vmem:[%s6352_s1] ss:$16 sps:$4 sm:$0xff]   ;;  %v4351_v22 = vld [vmem:[%s6352_s1 + $0xc] ss:$16 sps:$4 sm:$0xff]  }
   0x2   :  { %302 = vmatprep.subr.bf16.mxu1 %v4208_v0  ;;  %v4219_v2 = vld [vmem:[%s6352_s1 + $0x24] ss:$16 sps:$4 sm:$0xff]   ;;  %471 = vmatprep.subr.bf16.mxu0 %v4208_v0  ;;  %v4226_v3 = vld [vmem:[%s6352_s1 + $0x20] ss:$16 sps:$4 sm:$0xff]   ;;  %v4357_v23 = vld [vmem:[%s6352_s1 + $0x8] ss:$16 sps:$4 sm:$0xff]  }
   0x3   :  { %303 = vmatpush1.bf16.msra.mxu1 %v4213_v1  ;;  %472 = vmatpush1.bf16.msra.mxu0 %v4213_v1  ;;  %v4233_v4 = vld [vmem:[%s6352_s1 + $0x44] ss:$16 sps:$4 sm:$0xff]   ;;  %v4240_v5 = vld [vmem:[%s6352_s1 + $0x40] ss:$16 sps:$4 sm:$0xff]   ;;  %v4364_v24 = vld [vmem:[%s6352_s1 + $0x2c] ss:$16 sps:$4 sm:$0xff]  }
   0x4   :  { %304 = vmatprep.subr.bf16.mxu1 %v4219_v2  ;;  %473 = vmatprep.subr.bf16.mxu0 %v4219_v2  ;;  %v4247_v6 = vld [vmem:[%s6352_s1 + $0x64] ss:$16 sps:$4 sm:$0xff]   ;;  %v4254_v7 = vld [vmem:[%s6352_s1 + $0x60] ss:$16 sps:$4 sm:$0xff]   ;;  %v4390_v28 = vld [vmem:[%s6352_s1 + $0x28] ss:$16 sps:$4 sm:$0xff]  }
   0x5   :  { %v4261_v8 = vld [vmem:[%s6352_s1 + $0x84] ss:$16 sps:$4 sm:$0xff]   ;;  %v4273_v10 = vld [vmem:[%s6352_s1 + $0x80] ss:$16 sps:$4 sm:$0xff]   ;;  %v4398_v29 = vld [vmem:[%s6352_s1 + $0x4c] ss:$16 sps:$4 sm:$0xff]  }
   0x6   :  { %v4267_v9 = vld [vmem:[%s6353_s0 + $0x4] ss:$8 sps:$4 sm:$0xff]   ;;  %v4289_v12 = vld [vmem:[%s6352_s1 + $0xa0] ss:$16 sps:$4 sm:$0xff]   ;;  %v4333_v19 = vld [vmem:[%s6353_s0 + $0x34] ss:$8 sps:$4 sm:$0xff]  }
   0x7   :  { %305 = vmatpush1.bf16.msra.mxu1 %v4226_v3  ;;  %474 = vmatpush1.bf16.msra.mxu0 %v4226_v3  ;;  %v4281_v11 = vld [vmem:[%s6352_s1 + $0xa4] ss:$16 sps:$4 sm:$0xff]   ;;  %v4303_v14 = vld [vmem:[%s6352_s1 + $0xc0] ss:$16 sps:$4 sm:$0xff]   ;;  %v4414_v31 = vld [vmem:[%s6352_s1 + $0x48] ss:$16 sps:$4 sm:$0xff]  }
   0x8   :  { %306 = vmatprep.subr.bf16.mxu1 %v4233_v4  ;;  %475 = vmatprep.subr.bf16.mxu0 %v4233_v4  ;;  %v4295_v13 = vld [vmem:[%s6352_s1 + $0xc4] ss:$16 sps:$4 sm:$0xff]   ;;  %v4316_v16 = vld [vmem:[%s6352_s1 + $0xe0] ss:$16 sps:$4 sm:$0xff]   ;;  %v4425_v33 = vld [vmem:[%s6352_s1 + $0x6c] ss:$16 sps:$4 sm:$0xff]  }
   0x9   :  { %3312 = vmatprep.mubr.msk.bf16.mxu1 %vm279_vm0, %v4267_v9  ;;  %v4309_v15 = vld [vmem:[%s6352_s1 + $0xe4] ss:$16 sps:$4 sm:$0xff]   ;;  %v3739_v18 = vld [vmem:[%s6352_s1 + $0x100] ss:$16 sps:$4 sm:$0x3f]   ;;  %3332 = vmatprep.mubr.msk.bf16.mxu0 %vm279_vm0, %v4333_v19 }
   0xa   :  { %v4322_v17 = vld [vmem:[%s6352_s1 + $0x104] ss:$16 sps:$4 sm:$0x3f]   ;;  %v4341_v20 = vsel %vm289_vm1, %v3739_v18, 0  ;;  %v4346_v21 = vld [vmem:[%s6353_s0] ss:$8 sps:$4 sm:$0xff]  }
   0xb   :  { %307 = vmatpush1.bf16.msra.mxu1 %v4240_v5  ;;  %476 = vmatpush1.bf16.msra.mxu0 %v4240_v5  ;;  %v4369_v25 = vld [vmem:[%s6353_s0 + $0x14] ss:$8 sps:$4 sm:$0xff]   ;;  %v4374_v26 = vld [vmem:[%s6353_s0 + $0x30] ss:$8 sps:$4 sm:$0xff]   ;;  %v4383_v27 = vld [vmem:[%s6353_s0 + $0x44] ss:$8 sps:$4 sm:$0xff]  }
   0xc   :  { %308 = vmatprep.subr.bf16.mxu1 %v4247_v6  ;;  %477 = vmatprep.subr.bf16.mxu0 %v4247_v6  ;;  %v4407_v30 = vld [vmem:[%s6353_s0 + $0x10] ss:$8 sps:$4 sm:$0xff]   ;;  %v4419_v32 = vld [vmem:[%s6353_s0 + $0x24] ss:$8 sps:$4 sm:$0xff]   ;;  %v4430_v34 = vld [vmem:[%s6353_s0 + $0x40] ss:$8 sps:$4 sm:$0xff]  }
   0xd   :  { %v4436_v35 = vld [vmem:[%s6353_s0 + $0x54] ss:$8 sps:$4 sm:$0xff]   ;;  %v4444_v36 = vld [vmem:[%s6352_s1 + $0x68] ss:$16 sps:$4 sm:$0xff]   ;;  %v4485_v42 = vld [vmem:[%s6353_s0 + $0x64] ss:$8 sps:$4 sm:$0xff]  }
   0xe   :  { %v4452_v37 = vld [vmem:[%s6352_s1 + $0x8c] ss:$16 sps:$4 sm:$0xff]   ;;  %v4461_v38 = vld [vmem:[%s6353_s0 + $0x20] ss:$8 sps:$4 sm:$0xff]   ;;  %v4479_v41 = vld [vmem:[%s6353_s0 + $0x50] ss:$8 sps:$4 sm:$0xff]  }
   0xf   :  { %309 = vmatpush1.bf16.msra.mxu1 %v4254_v7  ;;  %478 = vmatpush1.bf16.msra.mxu0 %v4254_v7  ;;  %v4468_v39 = vld [vmem:[%s6352_s1 + $0x88] ss:$16 sps:$4 sm:$0xff]   ;;  %v4474_v40 = vld [vmem:[%s6352_s1 + $0xac] ss:$16 sps:$4 sm:$0xff]  }
  0x10   :  { %310 = vmatprep.subr.bf16.mxu1 %v4261_v8  ;;  %479 = vmatprep.subr.bf16.mxu0 %v4261_v8  ;;  %v4493_v43 = vld [vmem:[%s6352_s1 + $0xa8] ss:$16 sps:$4 sm:$0xff]   ;;  %v4501_v44 = vld [vmem:[%s6352_s1 + $0xcc] ss:$16 sps:$4 sm:$0xff]  }
  0x11   :  { %v4512_v45 = vld [vmem:[%s6352_s1 + $0xc8] ss:$16 sps:$4 sm:$0xff]   ;;  %v4518_v46 = vld [vmem:[%s6352_s1 + $0xec] ss:$16 sps:$4 sm:$0xff]  }
  0x12   :  { %v4526_v47 = vld [vmem:[%s6352_s1 + $0xe8] ss:$16 sps:$4 sm:$0xff]   ;;  %v4532_v48 = vld [vmem:[%s6352_s1 + $0x10c] ss:$16 sps:$4 sm:$0x3f]  }
  0x13   :  { %311 = vmatpush1.bf16.msra.mxu1 %v4273_v10  ;;  %480 = vmatpush1.bf16.msra.mxu0 %v4273_v10  ;;  %v3775_v49 = vld [vmem:[%s6352_s1 + $0x108] ss:$16 sps:$4 sm:$0x3f]   ;;  %v4559_v52 = vld [vmem:[%s6353_s0 + $0x74] ss:$8 sps:$4 sm:$0xff]  }
  0x14   :  { %312 = vmatprep.subr.bf16.mxu1 %v4281_v11  ;;  %481 = vmatprep.subr.bf16.mxu0 %v4281_v11  ;;  %v4543_v50 = vsel %vm289_vm1, %v3775_v49, 0  ;;  %v4553_v51 = vld [vmem:[%s6353_s0 + $0x60] ss:$8 sps:$4 sm:$0xff]   ;;  %v4577_v53 = vld [vmem:[%s6353_s0 + $0x70] ss:$8 sps:$4 sm:$0xff]  }
  0x15   :  { %v4583_v54 = vld [vmem:[%s6353_s0 + $0x84] ss:$8 sps:$4 sm:$0xff]   ;;  %v4601_v55 = vld [vmem:[%s6353_s0 + $0x80] ss:$8 sps:$4 sm:$0xff]   ;;  %v4607_v56 = vld [vmem:[%s6353_s0 + $0x94] ss:$8 sps:$4 sm:$0xff]  }
  0x16   :  { %v4639_v57 = vld [vmem:[%s6353_s0 + $0x90] ss:$8 sps:$4 sm:$0xff]   ;;  %v4645_v58 = vld [vmem:[%s6353_s0 + $0xa4] ss:$8 sps:$4 sm:$0xff]   ;;  %v4660_v59 = vld [vmem:[%s6353_s0 + $0xa0] ss:$8 sps:$4 sm:$0xff]  }
  0x17   :  { %313 = vmatpush1.bf16.msra.mxu1 %v4289_v12  ;;  %482 = vmatpush1.bf16.msra.mxu0 %v4289_v12  ;;  %v4665_v60 = vld [vmem:[%s6353_s0 + $0xb4] ss:$8 sps:$4 sm:$0xff]   ;;  %v4680_v61 = vld [vmem:[%s6353_s0 + $0xb0] ss:$8 sps:$4 sm:$0xff]   ;;  %v4693_v62 = vld [vmem:[%s6354_s3] ss:$8 sps:$4 sm:$0xff]  }
  0x18   :  { %314 = vmatprep.subr.bf16.mxu1 %v4295_v13  ;;  %483 = vmatprep.subr.bf16.mxu0 %v4295_v13  ;;  %v4698_v63 = vld [vmem:[%s6354_s3 + $0x4] ss:$8 sps:$4 sm:$0xff]  }
  0x19   :  { %v3835_v18 = vld [vmem:[%s6354_s3 + $0xa4] ss:$8 sps:$4 sm:$0xff]  }
  0x1b   :  { %315 = vmatpush1.bf16.msra.mxu1 %v4303_v14  ;;  %484 = vmatpush1.bf16.msra.mxu0 %v4303_v14 }
  0x1c   :  { %316 = vmatprep.subr.bf16.mxu1 %v4309_v15  ;;  %485 = vmatprep.subr.bf16.mxu0 %v4309_v15 }
  0x1f   :  { %317 = vmatpush1.bf16.msra.mxu1 %v4316_v16  ;;  %486 = vmatpush1.bf16.msra.mxu0 %v4316_v16 }
  0x20   :  { %3311 = vmatprep.subr.msk.bf16.mxu1 %vm289_vm1, %v4322_v17  ;;  %3331 = vmatprep.subr.msk.bf16.mxu0 %vm289_vm1, %v4322_v17 }
  0x23   :  { %319 = vmatpush1.bf16.msra.mxu1 %v4341_v20  ;;  %488 = vmatpush1.bf16.msra.mxu0 %v4341_v20 }
  0x24   :  { %365 = vmatprep.subr.bf16.mxu1 %v4351_v22  ;;  %711 = vmatprep.subr.bf16.mxu0 %v4208_v0 }
  0x26   :  { %335 = vmatmul.mubr.bf16.vlgmr.msra.gmra.mrb[0].mxu1 %v4346_v21  ;;  %504 = vmatmul.mubr.bf16.vlgmr.msra.gmra.mrb[0].mxu0 %v4374_v26 }
  0x27   :  { %366 = vmatpush1.bf16.msra.mxu1 %v4357_v23  ;;  %3313 = vmatprep.mubr.msk.bf16.mxu1 %vm279_vm0, %v4369_v25 }
  0x28   :  { %367 = vmatprep.subr.bf16.mxu1 %v4364_v24  ;;  %712 = vmatpush1.bf16.msra.mxu0 %v4213_v1 }
  0x29   :  { %3333 = vmatprep.mubr.msk.bf16.mxu0 %vm279_vm0, %v4383_v27  ;;  %713 = vmatprep.subr.bf16.mxu0 %v4219_v2 }
  0x2b   :  { %368 = vmatpush1.bf16.msra.mxu1 %v4390_v28 }
  0x2c   :  { %369 = vmatprep.subr.bf16.mxu1 %v4398_v29  ;;  %714 = vmatpush1.bf16.msra.mxu0 %v4226_v3 }
  0x2d   :  { %715 = vmatprep.subr.bf16.mxu0 %v4233_v4 }
  0x2e   :  { %345 = vmatmul.mubr.bf16.gmra.mrb[4].mxu1 %v4407_v30  ;;  %514 = vmatmul.mubr.bf16.gmra.mrb[4].mxu0 %v4430_v34 }
  0x2f   :  { %370 = vmatpush1.bf16.msra.mxu1 %v4414_v31  ;;  %3314 = vmatprep.mubr.msk.bf16.mxu1 %vm279_vm0, %v4419_v32 }
  0x30   :  { %371 = vmatprep.subr.bf16.mxu1 %v4425_v33  ;;  %716 = vmatpush1.bf16.msra.mxu0 %v4240_v5 }
  0x31   :  { %3334 = vmatprep.mubr.msk.bf16.mxu0 %vm279_vm0, %v4436_v35  ;;  %717 = vmatprep.subr.bf16.mxu0 %v4247_v6 }
  0x33   :  { %372 = vmatpush1.bf16.msra.mxu1 %v4444_v36 }
  0x34   :  { %373 = vmatprep.subr.bf16.mxu1 %v4452_v37  ;;  %718 = vmatpush1.bf16.msra.mxu0 %v4254_v7 }
  0x35   :  { %719 = vmatprep.subr.bf16.mxu0 %v4261_v8 }
  0x36   :  { %355 = vmatmul.mubr.bf16.gmra.mrb[8].mxu1 %v4461_v38  ;;  %524 = vmatmul.mubr.bf16.gmra.mrb[8].mxu0 %v4479_v41 }
  0x37   :  { %374 = vmatpush1.bf16.msra.mxu1 %v4468_v39  ;;  %3316 = vmatprep.mubr.msk.bf16.mxu1 %vm279_vm0, %v4267_v9  ;;  %v4779_v9 = vld [vmem:[%s6354_s3 + $0x54] ss:$8 sps:$4 sm:$0xff]  }
  0x38   :  { %375 = vmatprep.subr.bf16.mxu1 %v4474_v40  ;;  %720 = vmatpush1.bf16.msra.mxu0 %v4273_v10 }
  0x39   :  { %3352 = vmatprep.mubr.msk.bf16.mxu0 %vm279_vm0, %v4485_v42  ;;  %721 = vmatprep.subr.bf16.mxu0 %v4281_v11 }
  0x3b   :  { %376 = vmatpush1.bf16.msra.mxu1 %v4493_v43 }
  0x3c   :  { %377 = vmatprep.subr.bf16.mxu1 %v4501_v44  ;;  %722 = vmatpush1.bf16.msra.mxu0 %v4289_v12 }
  0x3d   :  { %723 = vmatprep.subr.bf16.mxu0 %v4295_v13 }
  0x3f   :  { %378 = vmatpush1.bf16.msra.mxu1 %v4512_v45 }
  0x40   :  { %379 = vmatprep.subr.bf16.mxu1 %v4518_v46  ;;  %724 = vmatpush1.bf16.msra.mxu0 %v4303_v14 }
  0x41   :  { %725 = vmatprep.subr.bf16.mxu0 %v4309_v15 }
  0x43   :  { %380 = vmatpush1.bf16.msra.mxu1 %v4526_v47 }
  0x44   :  { %3315 = vmatprep.subr.msk.bf16.mxu1 %vm289_vm1, %v4532_v48  ;;  %726 = vmatpush1.bf16.msra.mxu0 %v4316_v16 }
  0x45   :  { %3351 = vmatprep.subr.msk.bf16.mxu0 %vm289_vm1, %v4322_v17 }
  0x47   :  { %382 = vmatpush1.bf16.msra.mxu1 %v4543_v50 }
  0x48   :  { %534 = vmatprep.subr.bf16.mxu1 %v4351_v22  ;;  %728 = vmatpush1.bf16.msra.mxu0 %v4341_v20 }
  0x49   :  { %880 = vmatprep.subr.bf16.mxu0 %v4208_v0  ;;  %v4707_v0 = vld [vmem:[%s6354_s3 + $0x10] ss:$8 sps:$4 sm:$0xff]  }
  0x4a   :  { %398 = vmatmul.mubr.bf16.vlgmr.msra.gmra.mrb[12].mxu1 %v4346_v21  ;;  %v3836_v21 = vld [vmem:[%s6354_s3 + $0xb0] ss:$8 sps:$4 sm:$0xff]  }
  0x4b   :  { %535 = vmatpush1.bf16.msra.mxu1 %v4357_v23  ;;  %3317 = vmatprep.mubr.msk.bf16.mxu1 %vm279_vm0, %v4369_v25  ;;  %v3842_v25 = vld [vmem:[%s6354_s3 + $0xd0] ss:$8 sps:$4 sm:$0xff]  }
  0x4c   :  { %536 = vmatprep.subr.bf16.mxu1 %v4364_v24  ;;  %744 = vmatmul.mubr.bf16.vlgmr.msra.gmra.mrb[12].mxu0 %v4553_v51 }
  0x4d   :  { %881 = vmatpush1.bf16.msra.mxu0 %v4213_v1  ;;  %3353 = vmatprep.mubr.msk.bf16.mxu0 %vm279_vm0, %v4559_v52  ;;  %v4712_v1 = vld [vmem:[%s6354_s3 + $0x14] ss:$8 sps:$4 sm:$0xff]  }
  0x4e   :  { %882 = vmatprep.subr.bf16.mxu0 %v4219_v2  ;;  %v4721_v2 = vld [vmem:[%s6354_s3 + $0x20] ss:$8 sps:$4 sm:$0xff]  }
  0x4f   :  { %537 = vmatpush1.bf16.msra.mxu1 %v4390_v28 }
  0x50   :  { %538 = vmatprep.subr.bf16.mxu1 %v4398_v29 }
  0x51   :  { %883 = vmatpush1.bf16.msra.mxu0 %v4226_v3  ;;  %v4726_v3 = vld [vmem:[%s6354_s3 + $0x24] ss:$8 sps:$4 sm:$0xff]  }
  0x52   :  { %408 = vmatmul.mubr.bf16.gmra.mrb[16].mxu1 %v4407_v30  ;;  %884 = vmatprep.subr.bf16.mxu0 %v4233_v4  ;;  %v4732_v4 = vld [vmem:[%s6354_s3 + $0x34] ss:$8 sps:$4 sm:$0xff]   ;;  %v3853_v30 = vld [vmem:[%s6354_s3 + $0x104] ss:$8 sps:$4 sm:$0xff]  }
  0x53   :  { %539 = vmatpush1.bf16.msra.mxu1 %v4414_v31  ;;  %3318 = vmatprep.mubr.msk.bf16.mxu1 %vm279_vm0, %v4419_v32 }
  0x54   :  { %540 = vmatprep.subr.bf16.mxu1 %v4425_v33  ;;  %754 = vmatmul.mubr.bf16.gmra.mrb[16].mxu0 %v4577_v53 }
  0x55   :  { %885 = vmatpush1.bf16.msra.mxu0 %v4240_v5  ;;  %3354 = vmatprep.mubr.msk.bf16.mxu0 %vm279_vm0, %v4583_v54  ;;  %v4739_v5 = vld [vmem:[%s6354_s3 + $0x30] ss:$8 sps:$4 sm:$0xff]  }
  0x56   :  { %886 = vmatprep.subr.bf16.mxu0 %v4247_v6  ;;  %v4760_v6 = vld [vmem:[%s6354_s3 + $0x44] ss:$8 sps:$4 sm:$0xff]  }
  0x57   :  { %541 = vmatpush1.bf16.msra.mxu1 %v4444_v36 }
  0x58   :  { %542 = vmatprep.subr.bf16.mxu1 %v4452_v37 }
  0x59   :  { %887 = vmatpush1.bf16.msra.mxu0 %v4254_v7  ;;  %v4766_v7 = vld [vmem:[%s6354_s3 + $0x40] ss:$8 sps:$4 sm:$0xff]  }
  0x5a   :  { %418 = vmatmul.mubr.bf16.gmra.mrb[20].mxu1 %v4461_v38  ;;  %888 = vmatprep.subr.bf16.mxu0 %v4261_v8  ;;  %v4774_v8 = vld [vmem:[%s6354_s3 + $0x50] ss:$8 sps:$4 sm:$0xff]  }
  0x5b   :  { %543 = vmatpush1.bf16.msra.mxu1 %v4468_v39  ;;  %3336 = vmatprep.mubr.msk.bf16.mxu1 %vm279_vm0, %v4333_v19  ;;  %v3833_v19 = vld [vmem:[%s6354_s3 + $0xa0] ss:$8 sps:$4 sm:$0xff]  }
  0x5c   :  { %544 = vmatprep.subr.bf16.mxu1 %v4474_v40  ;;  %764 = vmatmul.mubr.bf16.gmra.mrb[20].mxu0 %v4601_v55 }
  0x5d   :  { %889 = vmatpush1.bf16.msra.mxu0 %v4273_v10  ;;  %3372 = vmatprep.mubr.msk.bf16.mxu0 %vm279_vm0, %v4607_v56  ;;  %v3823_v10 = vld [vmem:[%s6354_s3 + $0x64] ss:$8 sps:$4 sm:$0xff]  }
  0x5e   :  { %890 = vmatprep.subr.bf16.mxu0 %v4281_v11  ;;  %v3821_v11 = vld [vmem:[%s6354_s3 + $0x60] ss:$8 sps:$4 sm:$0xff]  }
  0x5f   :  { %545 = vmatpush1.bf16.msra.mxu1 %v4493_v43 }
  0x60   :  { %546 = vmatprep.subr.bf16.mxu1 %v4501_v44 }
  0x61   :  { %891 = vmatpush1.bf16.msra.mxu0 %v4289_v12  ;;  %v3824_v12 = vld [vmem:[%s6354_s3 + $0x70] ss:$8 sps:$4 sm:$0xff]  }
  0x62   :  { %892 = vmatprep.subr.bf16.mxu0 %v4295_v13  ;;  %v3826_v13 = vld [vmem:[%s6354_s3 + $0x74] ss:$8 sps:$4 sm:$0xff]  }
  0x63   :  { %547 = vmatpush1.bf16.msra.mxu1 %v4512_v45 }
  0x64   :  { %548 = vmatprep.subr.bf16.mxu1 %v4518_v46 }
  0x65   :  { %893 = vmatpush1.bf16.msra.mxu0 %v4303_v14  ;;  %v3829_v14 = vld [vmem:[%s6354_s3 + $0x84] ss:$8 sps:$4 sm:$0xff]  }
  0x66   :  { %894 = vmatprep.subr.bf16.mxu0 %v4309_v15  ;;  %v3827_v15 = vld [vmem:[%s6354_s3 + $0x80] ss:$8 sps:$4 sm:$0xff]  }
  0x67   :  { %549 = vmatpush1.bf16.msra.mxu1 %v4526_v47 }
  0x68   :  { %3335 = vmatprep.subr.msk.bf16.mxu1 %vm289_vm1, %v4532_v48 }
  0x69   :  { %895 = vmatpush1.bf16.msra.mxu0 %v4316_v16  ;;  %v3830_v16 = vld [vmem:[%s6354_s3 + $0x90] ss:$8 sps:$4 sm:$0xff]  }
  0x6a   :  { %3371 = vmatprep.subr.msk.bf16.mxu0 %vm289_vm1, %v4322_v17  ;;  %v3832_v17 = vld [vmem:[%s6354_s3 + $0x94] ss:$8 sps:$4 sm:$0xff]  }
  0x6b   :  { %551 = vmatpush1.bf16.msra.mxu1 %v4543_v50 }
  0x6c   :  { %774 = vmatprep.subr.bf16.mxu1 %v4351_v22 }
  0x6d   :  { %897 = vmatpush1.bf16.msra.mxu0 %v4341_v20  ;;  %v3838_v20 = vld [vmem:[%s6354_s3 + $0xb4] ss:$8 sps:$4 sm:$0xff]  }
  0x6e   :  { %567 = vmatmul.mubr.bf16.vlgmr.msra.gmra.mrb[24].mxu1 %v4374_v26  ;;  %2044 = vmatprep.subr.bf16.mxu0 %v4698_v63  ;;  %v3847_v26 = vld [vmem:[%s6354_s3 + $0xe4] ss:$8 sps:$4 sm:$0xff]  }
  0x6f   :  { %775 = vmatpush1.bf16.msra.mxu1 %v4357_v23  ;;  %3337 = vmatprep.mubr.msk.bf16.mxu1 %vm279_vm0, %v4383_v27  ;;  %v3845_v27 = vld [vmem:[%s6354_s3 + $0xe0] ss:$8 sps:$4 sm:$0xff]  }
  0x70   :  { %776 = vmatprep.subr.bf16.mxu1 %v4364_v24  ;;  %913 = vmatmul.mubr.bf16.vlgmr.msra.gmra.mrb[24].mxu0 %v4639_v57 }
  0x71   :  { %3373 = vmatprep.mubr.msk.bf16.mxu0 %vm279_vm0, %v4645_v58  ;;  %2045 = vmatpush1.bf16.msra.mxu0 %v4693_v62 }
  0x72   :  { %2046 = vmatprep.subr.bf16.mxu0 %v4712_v1 }
  0x73   :  { %777 = vmatpush1.bf16.msra.mxu1 %v4390_v28 }
  0x74   :  { %778 = vmatprep.subr.bf16.mxu1 %v4398_v29 }
  0x75   :  { %2047 = vmatpush1.bf16.msra.mxu0 %v4707_v0 }
  0x76   :  { %577 = vmatmul.mubr.bf16.gmra.mrb[28].mxu1 %v4430_v34  ;;  %2048 = vmatprep.subr.bf16.mxu0 %v4726_v3 }
  0x77   :  { %779 = vmatpush1.bf16.msra.mxu1 %v4414_v31  ;;  %3338 = vmatprep.mubr.msk.bf16.mxu1 %vm279_vm0, %v4436_v35 }
  0x78   :  { %780 = vmatprep.subr.bf16.mxu1 %v4425_v33  ;;  %923 = vmatmul.mubr.bf16.gmra.mrb[28].mxu0 %v4660_v59 }
  0x79   :  { %3374 = vmatprep.mubr.msk.bf16.mxu0 %vm279_vm0, %v4665_v60  ;;  %2049 = vmatpush1.bf16.msra.mxu0 %v4721_v2 }
  0x7a   :  { %2050 = vmatprep.subr.bf16.mxu0 %v4732_v4 }
  0x7b   :  { %781 = vmatpush1.bf16.msra.mxu1 %v4444_v36 }
  0x7c   :  { %782 = vmatprep.subr.bf16.mxu1 %v4452_v37 }
  0x7d   :  { %2051 = vmatpush1.bf16.msra.mxu0 %v4739_v5 }
  0x7e   :  { %587 = vmatmul.mubr.bf16.gmra.mrb[32].mxu1 %v4479_v41  ;;  %2052 = vmatprep.subr.bf16.mxu0 %v4760_v6 }
  0x7f   :  { %783 = vmatpush1.bf16.msra.mxu1 %v4468_v39  ;;  %3356 = vmatprep.mubr.msk.bf16.mxu1 %vm279_vm0, %v4485_v42 }
  0x80   :  { %784 = vmatprep.subr.bf16.mxu1 %v4474_v40  ;;  %933 = vmatmul.mubr.bf16.gmra.mrb[32].mxu0 %v4680_v61 }
  0x81   :  { %2053 = vmatpush1.bf16.msra.mxu0 %v4766_v7 }
  0x82   :  { %2054 = vmatprep.subr.bf16.mxu0 %v4779_v9 }
  0x83   :  { %785 = vmatpush1.bf16.msra.mxu1 %v4493_v43 }
  0x84   :  { %786 = vmatprep.subr.bf16.mxu1 %v4501_v44 }
  0x85   :  { %2055 = vmatpush1.bf16.msra.mxu0 %v4774_v8 }
  0x86   :  { %2056 = vmatprep.subr.bf16.mxu0 %v3823_v10 }
  0x87   :  { %787 = vmatpush1.bf16.msra.mxu1 %v4512_v45 }
  0x88   :  { %788 = vmatprep.subr.bf16.mxu1 %v4518_v46 }
  0x89   :  { %2057 = vmatpush1.bf16.msra.mxu0 %v3821_v11 }
  0x8a   :  { %2058 = vmatprep.subr.bf16.mxu0 %v3826_v13 }
  0x8b   :  { %789 = vmatpush1.bf16.msra.mxu1 %v4526_v47 }
  0x8c   :  { %3355 = vmatprep.subr.msk.bf16.mxu1 %vm289_vm1, %v4532_v48 }
  0x8d   :  { %2059 = vmatpush1.bf16.msra.mxu0 %v3824_v12 }
  0x8e   :  { %2060 = vmatprep.subr.bf16.mxu0 %v3829_v14 }
  0x8f   :  { %791 = vmatpush1.bf16.msra.mxu1 %v4543_v50 }
  0x90   :  { %943 = vmatprep.subr.bf16.mxu1 %v4351_v22  ;;  %v3841_v22 = vld [vmem:[%s6354_s3 + $0xc4] ss:$8 sps:$4 sm:$0xff]  }
  0x91   :  { %2061 = vmatpush1.bf16.msra.mxu0 %v3827_v15 }
  0x92   :  { %807 = vmatmul.mubr.bf16.vlgmr.msra.gmra.mrb[36].mxu1 %v4553_v51  ;;  %2062 = vmatprep.subr.bf16.mxu0 %v3832_v17 }
  0x93   :  { %944 = vmatpush1.bf16.msra.mxu1 %v4357_v23  ;;  %3357 = vmatprep.mubr.msk.bf16.mxu1 %vm279_vm0, %v4559_v52  ;;  %v3839_v23 = vld [vmem:[%s6354_s3 + $0xc0] ss:$8 sps:$4 sm:$0xff]  }
  0x94   :  { %945 = vmatprep.subr.bf16.mxu1 %v4364_v24  ;;  %v3844_v24 = vld [vmem:[%s6354_s3 + $0xd4] ss:$8 sps:$4 sm:$0xff]  }
  0x95   :  { %2063 = vmatpush1.bf16.msra.mxu0 %v3830_v16 }
  0x96   :  { %2064 = vmatprep.subr.bf16.mxu0 %v3835_v18 }
  0x97   :  { %946 = vmatpush1.bf16.msra.mxu1 %v4390_v28  ;;  %v3850_v28 = vld [vmem:[%s6354_s3 + $0xf4] ss:$8 sps:$4 sm:$0xff]  }
  0x98   :  { %947 = vmatprep.subr.bf16.mxu1 %v4398_v29  ;;  %v3848_v29 = vld [vmem:[%s6354_s3 + $0xf0] ss:$8 sps:$4 sm:$0xff]  }
  0x99   :  { %2065 = vmatpush1.bf16.msra.mxu0 %v3833_v19 }
  0x9a   :  { %817 = vmatmul.mubr.bf16.gmra.mrb[40].mxu1 %v4577_v53  ;;  %2066 = vmatprep.subr.bf16.mxu0 %v3838_v20 }
  0x9b   :  { %948 = vmatpush1.bf16.msra.mxu1 %v4414_v31  ;;  %3358 = vmatprep.mubr.msk.bf16.mxu1 %vm279_vm0, %v4583_v54 }
  0x9c   :  { %949 = vmatprep.subr.bf16.mxu1 %v4425_v33 }
  0x9d   :  { %2067 = vmatpush1.bf16.msra.mxu0 %v3836_v21 }
  0x9e   :  { %2068 = vmatprep.subr.bf16.mxu0 %v3841_v22 }
  0x9f   :  { %950 = vmatpush1.bf16.msra.mxu1 %v4444_v36 }
  0xa0   :  { %951 = vmatprep.subr.bf16.mxu1 %v4452_v37 }
  0xa1   :  { %2069 = vmatpush1.bf16.msra.mxu0 %v3839_v23 }
  0xa2   :  { %827 = vmatmul.mubr.bf16.gmra.mrb[44].mxu1 %v4601_v55  ;;  %2070 = vmatprep.subr.bf16.mxu0 %v3844_v24 }
  0xa3   :  { %952 = vmatpush1.bf16.msra.mxu1 %v4468_v39  ;;  %3376 = vmatprep.mubr.msk.bf16.mxu1 %vm279_vm0, %v4607_v56 }
  0xa4   :  { %953 = vmatprep.subr.bf16.mxu1 %v4474_v40 }
  0xa5   :  { %2071 = vmatpush1.bf16.msra.mxu0 %v3842_v25 }
  0xa6   :  { %2072 = vmatprep.subr.bf16.mxu0 %v3847_v26 }
  0xa7   :  { %954 = vmatpush1.bf16.msra.mxu1 %v4493_v43 }
  0xa8   :  { %955 = vmatprep.subr.bf16.mxu1 %v4501_v44 }
  0xa9   :  { %2073 = vmatpush1.bf16.msra.mxu0 %v3845_v27 }
  0xaa   :  { %2074 = vmatprep.subr.bf16.mxu0 %v3850_v28 }
  0xab   :  { %956 = vmatpush1.bf16.msra.mxu1 %v4512_v45 }
  0xac   :  { %957 = vmatprep.subr.bf16.mxu1 %v4518_v46 }
  0xad   :  { %2075 = vmatpush1.bf16.msra.mxu0 %v3848_v29 }
  0xae   :  { %2097 = vmatprep.subr.bf16.mxu0 %v3853_v30 }
  0xaf   :  { %958 = vmatpush1.bf16.msra.mxu1 %v4526_v47 }
  0xb0   :  { %3375 = vmatprep.subr.msk.bf16.mxu1 %vm289_vm1, %v4532_v48 }
  0xb3   :  { %960 = vmatpush1.bf16.msra.mxu1 %v4543_v50 }
  0xb4   :  { %2311 = vmatprep.subr.bf16.mxu1 %v4698_v63 }
  0xb6   :  { %976 = vmatmul.mubr.bf16.vlgmr.msra.gmra.mrb[48].mxu1 %v4639_v57 }
  0xb7   :  { %3377 = vmatprep.mubr.msk.bf16.mxu1 %vm279_vm0, %v4645_v58  ;;  %2312 = vmatpush1.bf16.msra.mxu1 %v4693_v62 }
  0xb8   :  { %2313 = vmatprep.subr.bf16.mxu1 %v4712_v1 }
  0xbb   :  { %2314 = vmatpush1.bf16.msra.mxu1 %v4707_v0 }
  0xbc   :  { %2315 = vmatprep.subr.bf16.mxu1 %v4726_v3 }
  0xbe   :  { %986 = vmatmul.mubr.bf16.gmra.mrb[52].mxu1 %v4660_v59 }
  0xbf   :  { %3378 = vmatprep.mubr.msk.bf16.mxu1 %vm279_vm0, %v4665_v60  ;;  %2316 = vmatpush1.bf16.msra.mxu1 %v4721_v2 }
  0xc0   :  { %2317 = vmatprep.subr.bf16.mxu1 %v4732_v4 }
  0xc3   :  { %2318 = vmatpush1.bf16.msra.mxu1 %v4739_v5 }
  0xc4   :  { %2319 = vmatprep.subr.bf16.mxu1 %v4760_v6 }
  0xc6   :  { %996 = vmatmul.mubr.bf16.gmra.mrb[56].mxu1 %v4680_v61 }
  0xc7   :  { %2320 = vmatpush1.bf16.msra.mxu1 %v4766_v7 }
  0xc8   :  { %2321 = vmatprep.subr.bf16.mxu1 %v4779_v9 }
  0xcb   :  { %2322 = vmatpush1.bf16.msra.mxu1 %v4774_v8 }
  0xcc   :  { %2323 = vmatprep.subr.bf16.mxu1 %v3823_v10 }
  0xcf   :  { %2324 = vmatpush1.bf16.msra.mxu1 %v3821_v11 }
  0xd0   :  { %2325 = vmatprep.subr.bf16.mxu1 %v3826_v13 }
  0xd3   :  { %2326 = vmatpush1.bf16.msra.mxu1 %v3824_v12 }
  0xd4   :  { %2327 = vmatprep.subr.bf16.mxu1 %v3829_v14 }
  0xd7   :  { %2328 = vmatpush1.bf16.msra.mxu1 %v3827_v15 }
  0xd8   :  { %2329 = vmatprep.subr.bf16.mxu1 %v3832_v17 }
  0xdb   :  { %2330 = vmatpush1.bf16.msra.mxu1 %v3830_v16 }
  0xdc   :  { %2331 = vmatprep.subr.bf16.mxu1 %v3835_v18 }
  0xdf   :  { %2332 = vmatpush1.bf16.msra.mxu1 %v3833_v19 }
  0xe0   :  { %2333 = vmatprep.subr.bf16.mxu1 %v3838_v20 }
  0xe3   :  { %2334 = vmatpush1.bf16.msra.mxu1 %v3836_v21 }
  0xe4   :  { %2335 = vmatprep.subr.bf16.mxu1 %v3841_v22 }
  0xe7   :  { %2336 = vmatpush1.bf16.msra.mxu1 %v3839_v23 }
  0xe8   :  { %2337 = vmatprep.subr.bf16.mxu1 %v3844_v24 }
  0xeb   :  { %2338 = vmatpush1.bf16.msra.mxu1 %v3842_v25 }
  0xec   :  { %2339 = vmatprep.subr.bf16.mxu1 %v3847_v26 }
  0xef   :  { %2340 = vmatpush1.bf16.msra.mxu1 %v3845_v27  ;;  %v634_v27 = vlaneseq }
  0xf0   :  { %2341 = vmatprep.subr.bf16.mxu1 %v3850_v28 }
  0xf1   :  { %v4986_v28 = vshrl.u32 %v634_v27, 7 }
  0xf3   :  { %2342 = vmatpush1.bf16.msra.mxu1 %v3848_v29  ;;  %6393 = vst [vmem:[#allocation2_spill] sm:$0xff] %v4986_v28  ;;  %v6362_v29 = vsub.s32 0, %v4986_v28 }
  0xf4   :  { %2364 = vmatprep.subr.bf16.mxu1 %v3853_v30  ;;  %v69_v30 = vld [vmem:[%s6355_s2] sm:$0x3] }
  0xf9   :  { %v4878_v31 = vpop.f32.mrb[0].mxu1  ;;  %v4884_v34 = vpop.f32.mrb[0].mxu0 }
  0xfa   :  { %v4880_v32 = vpop.f32.mrb[1].mxu1  ;;  %v4888_v36 = vpop.f32.mrb[1].mxu0 }
  0xfb   :  { %v4882_v33 = vpop.f32.mrb[2].mxu1  ;;  %v4890_v37 = vpop.f32.mrb[2].mxu0 }
  0xfc   :  { %v4886_v35 = vpop.f32.mrb[3].mxu1  ;;  %v4892_v38 = vpop.f32.mrb[3].mxu0 }
 0x101   :  { %v4894_v39 = vpop.f32.mrb[4].mxu1  ;;  %v4900_v42 = vpop.f32.mrb[4].mxu0 }
 0x102   :  { %v4896_v40 = vpop.f32.mrb[5].mxu1  ;;  %v4904_v44 = vpop.f32.mrb[5].mxu0 }
 0x103   :  { %v4898_v41 = vpop.f32.mrb[6].mxu1  ;;  %v4906_v45 = vpop.f32.mrb[6].mxu0 }
 0x104   :  { %v4902_v43 = vpop.f32.mrb[7].mxu1  ;;  %v4908_v46 = vpop.f32.mrb[7].mxu0 }
 0x109   :  { %v4910_v47 = vpop.f32.mrb[8].mxu1  ;;  %v4916_v50 = vpop.f32.mrb[8].mxu0 }
 0x10a   :  { %v4912_v48 = vpop.f32.mrb[9].mxu1  ;;  %v4920_v52 = vpop.f32.mrb[9].mxu0 }
 0x10b   :  { %v4914_v49 = vpop.f32.mrb[10].mxu1  ;;  %v4922_v53 = vpop.f32.mrb[10].mxu0 }
 0x10c   :  { %v4918_v51 = vpop.f32.mrb[11].mxu1  ;;  %v4924_v54 = vpop.f32.mrb[11].mxu0 }
 0x11d   :  { %v399_v55 = vpop.f32.mrb[12].mxu1 }
 0x11e   :  { %v597_v56 = vmax.f32 %v4878_v31, %v399_v55  ;;  %v401_v57 = vpop.f32.mrb[13].mxu1  ;;  %v6363_v31 = vsub.s32 1, %v4986_v28  ;;  %v5230_v28 = vld [vmem:[%s6354_s3 + $0x190] ss:$8 sps:$4 sm:$0xff]  }
 0x11f   :  { %v598_v58 = vmax.f32 %v4880_v32, %v401_v57  ;;  %v403_v59 = vpop.f32.mrb[14].mxu1  ;;  %v4928_v60 = vpop.f32.mrb[12].mxu0  ;;  %6412 = vst [vmem:[#allocation16_spill] sm:$0xff] %v5230_v28 }
 0x120   :  { %v599_v61 = vmax.f32 %v4882_v33, %v403_v59  ;;  %v405_v62 = vpop.f32.mrb[15].mxu1  ;;  %v4931_v63 = vpop.f32.mrb[13].mxu0  ;;  %v5001_v57 = vrot.slane %v69_v30, %v6363_v31 }
 0x121   :  { %v600_v0 = vmax.f32 %v4886_v35, %v405_v62  ;;  %v4934_v1 = vpop.f32.mrb[14].mxu0  ;;  %v4996_v35 = vrot.slane %v69_v30, %v6362_v29 }
 0x122   :  { %v4936_v2 = vpop.f32.mrb[15].mxu0 }
 0x125   :  { %v4938_v3 = vpop.f32.mrb[16].mxu1 }
 0x126   :  { %v601_v4 = vmax.f32 %v4894_v39, %v4938_v3  ;;  %v4942_v5 = vpop.f32.mrb[17].mxu1 }
 0x127   :  { %v602_v6 = vmax.f32 %v4896_v40, %v4942_v5  ;;  %v4946_v7 = vpop.f32.mrb[18].mxu1  ;;  %v4948_v8 = vpop.f32.mrb[16].mxu0  ;;  %v5042_v40 = vld [vmem:[%s6354_s3 + $0x114] ss:$8 sps:$4 sm:$0xff]  }
 0x128   :  { %v603_v9 = vmax.f32 %v4898_v41, %v4946_v7  ;;  %v4952_v10 = vpop.f32.mrb[19].mxu1  ;;  %v4954_v11 = vpop.f32.mrb[17].mxu0 }
 0x129   :  { %v4958_v13 = vpop.f32.mrb[18].mxu0 }
 0x12a   :  { %v4960_v14 = vpop.f32.mrb[19].mxu0 }
 0x12d   :  { %v4962_v15 = vpop.f32.mrb[20].mxu1 }
 0x12e   :  { %v4966_v17 = vpop.f32.mrb[21].mxu1 }
 0x12f   :  { %v4970_v19 = vpop.f32.mrb[22].mxu1  ;;  %v4972_v20 = vpop.f32.mrb[20].mxu0 }
 0x130   :  { %v4976_v22 = vpop.f32.mrb[23].mxu1  ;;  %v4978_v23 = vpop.f32.mrb[21].mxu0 }
 0x131   :  { %v4982_v25 = vpop.f32.mrb[22].mxu0 }
 0x132   :  { %v4984_v26 = vpop.f32.mrb[23].mxu0 }
 0x141   :  { %v568_v32 = vpop.f32.mrb[24].mxu1 }
 0x142   :  { %v609_v33 = vmax.f32 %v4884_v34, %v568_v32  ;;  %v570_v39 = vpop.f32.mrb[25].mxu1 }
 0x143   :  { %v610_v55 = vmax.f32 %v4888_v36, %v570_v39  ;;  %v572_v59 = vpop.f32.mrb[26].mxu1  ;;  %v5003_v62 = vpop.f32.mrb[24].mxu0 }
 0x144   :  { %v621_v3 = vmax.f32 %v597_v56, %v609_v33  ;;  %v611_v27 = vmax.f32 %v4890_v37, %v572_v59  ;;  %v574_v24 = vpop.f32.mrb[27].mxu1  ;;  %v5006_v21 = vpop.f32.mrb[25].mxu0 }
 0x145   :  { %v622_v34 = vmax.f32 %v598_v58, %v610_v55  ;;  %v612_v32 = vmax.f32 %v4892_v38, %v574_v24  ;;  %v5009_v29 = vpop.f32.mrb[26].mxu0 }
 0x146   :  { %v644_v36 = vadd.f32 %v4996_v35, %v621_v3  ;;  %v623_v39 = vmax.f32 %v599_v61, %v611_v27  ;;  %v5012_v18 = vpop.f32.mrb[27].mxu0 }
 0x147   :  { %v645_v30 = vadd.f32 %v5001_v57, %v622_v34  ;;  %v624_v31 = vmax.f32 %v600_v0, %v612_v32 }
 0x148   :  { %v646_v56 = vadd.f32 %v4996_v35, %v623_v39  ;;  %v656_v59 = vmax.f32 %v644_v36, 0.0 }
 0x149   :  { %v647_v37 = vadd.f32 %v5001_v57, %v624_v31  ;;  %v578_v33 = vpop.f32.mrb[28].mxu1  ;;  %v657_v24 = vmax.f32 %v645_v30, 0.0 }
 0x14a   :  { %v658_v16 = vmax.f32 %v646_v56, 0.0  ;;  %v613_v58 = vmax.f32 %v4900_v42, %v578_v33  ;;  %v580_v38 = vpop.f32.mrb[29].mxu1 }
 0x14b   :  { %v659_v55 = vmax.f32 %v647_v37, 0.0  ;;  %v614_v3 = vmax.f32 %v4904_v44, %v580_v38  ;;  %v582_v61 = vpop.f32.mrb[30].mxu1  ;;  %v5019_v27 = vpop.f32.mrb[28].mxu0  ;;  %v5031_v44 = vld [vmem:[%s6354_s3 + $0x100] ss:$8 sps:$4 sm:$0xff]  }
 0x14c   :  { %v1226_v12 = vpack.c.bf16 %v658_v16, %v656_v59  ;;  %v625_v34 = vmax.f32 %v601_v4, %v613_v58  ;;  %v615_v0 = vmax.f32 %v4906_v45, %v582_v61  ;;  %v584_v32 = vpop.f32.mrb[31].mxu1  ;;  %v5022_v39 = vpop.f32.mrb[29].mxu0  ;;  %v5056_v59 = vld [vmem:[%s6354_s3 + $0x110] ss:$8 sps:$4 sm:$0xff]  }
 0x14d   :  { %v626_v31 = vmax.f32 %v602_v6, %v614_v3  ;;  %v616_v42 = vmax.f32 %v4908_v46, %v584_v32  ;;  %v1227_v36 = vpack.c.bf16 %v659_v55, %v657_v24  ;;  %v5033_v30 = vpop.f32.mrb[30].mxu0  ;;  %v6394_v6 = vmax.f32 %v4902_v43, %v4952_v10 }
 0x14e   :  { %v648_v4 = vadd.f32 %v4996_v35, %v625_v34  ;;  %v627_v45 = vmax.f32 %v603_v9, %v615_v0  ;;  %v5044_v46 = vpop.f32.mrb[31].mxu0 }
 0x14f   :  { %v649_v5 = vadd.f32 %v5001_v57, %v626_v31  ;;  %v628_v56 = vmax.f32 %v6394_v6, %v616_v42  ;;  %2076 = vmatprep.mubr.bf16.mxu0 %v1227_v36 }
 0x150   :  { %v660_v37 = vmax.f32 %v648_v4, 0.0  ;;  %v650_v33 = vadd.f32 %v4996_v35, %v627_v45  ;;  %2077 = vmatmul.mubr.bf16.vlgmr.msra.gmra.mrb[36].mxu0 %v1226_v12  ;;  %v5065_v12 = vld [vmem:[%s6354_s3 + $0x124] ss:$8 sps:$4 sm:$0xff]   ;;  %v6398_v4 = vmax.f32 %v4912_v48, %v4966_v17 }
 0x151   :  { %v661_v41 = vmax.f32 %v649_v5, 0.0  ;;  %v651_v7 = vadd.f32 %v5001_v57, %v628_v56  ;;  %v588_v9 = vpop.f32.mrb[32].mxu1  ;;  %2098 = vmatpush1.bf16.msra.mxu0 %v5031_v44  ;;  %v6401_v56 = vmax.f32 %v4918_v51, %v4976_v22  ;;  %v5124_v51 = vld [vmem:[%s6354_s3 + $0x144] ss:$8 sps:$4 sm:$0xff]  }
 0x152   :  { %v5058_v58 = vpack.c.bf16 %v660_v37, %v658_v16  ;;  %v662_v43 = vmax.f32 %v650_v33, 0.0  ;;  %v617_v10 = vmax.f32 %v4916_v50, %v588_v9  ;;  %v590_v38 = vpop.f32.mrb[33].mxu1  ;;  %2099 = vmatprep.subr.bf16.mxu0 %v5042_v40  ;;  %v6396_v16 = vmax.f32 %v4910_v47, %v4962_v15  ;;  %v5090_v47 = vld [vmem:[%s6354_s3 + $0x120] ss:$8 sps:$4 sm:$0xff]  }
 0x153   :  { %v663_v24 = vmax.f32 %v651_v7, 0.0  ;;  %v618_v3 = vmax.f32 %v4920_v52, %v590_v38  ;;  %v592_v61 = vpop.f32.mrb[34].mxu1  ;;  %v5068_v34 = vpop.f32.mrb[32].mxu0  ;;  %v5070_v0 = vpack.c.bf16 %v661_v41, %v659_v55  ;;  %v6400_v55 = vmax.f32 %v4914_v49, %v4970_v19  ;;  %v5118_v7 = vld [vmem:[%s6354_s3 + $0x130] ss:$8 sps:$4 sm:$0xff]  }
 0x154   :  { %6395 = vst [vmem:[#allocation3_spill] sm:$0xff] %v5058_v58  ;;  %v629_v50 = vmax.f32 %v6396_v16, %v617_v10  ;;  %v619_v32 = vmax.f32 %v4922_v53, %v592_v61  ;;  %v594_v31 = vpop.f32.mrb[35].mxu1  ;;  %v5076_v42 = vpack.c.bf16 %v662_v43, %v660_v37  ;;  %v5078_v36 = vpop.f32.mrb[33].mxu0  ;;  %v5136_v61 = vld [vmem:[%s6354_s3 + $0x140] ss:$8 sps:$4 sm:$0xff]  }
 0x155   :  { %v630_v52 = vmax.f32 %v6398_v4, %v618_v3  ;;  %v620_v45 = vmax.f32 %v4924_v54, %v594_v31  ;;  %v5084_v5 = vpack.c.bf16 %v663_v24, %v661_v41  ;;  %2100 = vmatpush1.bf16.msra.mxu0 %v5056_v59  ;;  %v5092_v53 = vpop.f32.mrb[34].mxu0  ;;  %v5102_v54 = vld [vmem:[%s6354_s3 + $0x134] ss:$8 sps:$4 sm:$0xff]   ;;  %v5164_v31 = vld [vmem:[%s6354_s3 + $0x160] ss:$8 sps:$4 sm:$0xff]  }
 0x156   :  { %6397 = vst [vmem:[#allocation4_spill] sm:$0xff] %v5076_v42  ;;  %v652_v15 = vadd.f32 %v4996_v35, %v629_v50  ;;  %v631_v48 = vmax.f32 %v6400_v55, %v619_v32  ;;  %2101 = vmatprep.subr.bf16.mxu0 %v5065_v12  ;;  %v5104_v17 = vpop.f32.mrb[35].mxu0  ;;  %v5156_v50 = vld [vmem:[%s6354_s3 + $0x164] ss:$8 sps:$4 sm:$0xff]   ;;  %6406 = vst [vmem:[#allocation10_spill] sm:$0xff] %v5164_v31 }
 0x157   :  { %6399 = vst [vmem:[#allocation5_spill] sm:$0xff] %v5084_v5  ;;  %v653_v6 = vadd.f32 %v5001_v57, %v630_v52  ;;  %v632_v37 = vmax.f32 %v6401_v56, %v620_v45  ;;  %2086 = vmatprep.mubr.bf16.mxu0 %v5084_v5  ;;  %v5174_v45 = vld [vmem:[%s6354_s3 + $0x174] ss:$8 sps:$4 sm:$0xff]   ;;  %v5236_v56 = vld [vmem:[%s6354_s3 + $0x1a4] ss:$8 sps:$4 sm:$0xff]  }
 0x158   :  { %v664_v33 = vmax.f32 %v652_v15, 0.0  ;;  %v654_v49 = vadd.f32 %v4996_v35, %v631_v48  ;;  %2087 = vmatmul.mubr.bf16.gmra.mrb[40].mxu0 %v5076_v42  ;;  %6407 = vst [vmem:[#allocation11_spill] sm:$0xff] %v5174_v45  ;;  %6413 = vst [vmem:[#allocation17_spill] sm:$0xff] %v5236_v56  ;;  %v5254_v42 = vld [vmem:[%s6354_s3 + $0x1b4] ss:$8 sps:$4 sm:$0xff]  }
 0x159   :  { %v665_v19 = vmax.f32 %v653_v6, 0.0  ;;  %v655_v41 = vadd.f32 %v5001_v57, %v632_v37  ;;  %2102 = vmatpush1.bf16.msra.mxu0 %v5090_v47  ;;  %v5190_v37 = vld [vmem:[%s6354_s3 + $0x170] ss:$8 sps:$4 sm:$0xff]   ;;  %6415 = vst [vmem:[#allocation19_spill] sm:$0xff] %v5254_v42  ;;  %v5276_v5 = vld [vmem:[%s6354_s3 + $0x1c4] ss:$8 sps:$4 sm:$0xff]  }
 0x15a   :  { %v666_v9 = vmax.f32 %v654_v49, 0.0  ;;  %2103 = vmatprep.subr.bf16.mxu0 %v5102_v54  ;;  %v5126_v22 = vpack.c.bf16 %v664_v33, %v662_v43  ;;  %v5144_v43 = vld [vmem:[%s6354_s3 + $0x154] ss:$8 sps:$4 sm:$0xff]   ;;  %6408 = vst [vmem:[#allocation12_spill] sm:$0xff] %v5190_v37  ;;  %6417 = vst [vmem:[#allocation21_spill] sm:$0xff] %v5276_v5 }
 0x15b   :  { %v667_v10 = vmax.f32 %v655_v41, 0.0  ;;  %v5128_v38 = vpack.c.bf16 %v665_v19, %v663_v24  ;;  %v5150_v24 = vld [vmem:[%s6354_s3 + $0x150] ss:$8 sps:$4 sm:$0xff]   ;;  %v5244_v41 = vld [vmem:[%s6354_s3 + $0x1a0] ss:$8 sps:$4 sm:$0xff]  }
 0x15c   :  { %6402 = vst [vmem:[#allocation6_spill] sm:$0xff] %v5126_v22  ;;  %v5130_v3 = vpack.c.bf16 %v666_v9, %v664_v33  ;;  %v5196_v33 = vld [vmem:[%s6354_s3 + $0x184] ss:$8 sps:$4 sm:$0xff]   ;;  %6414 = vst [vmem:[#allocation18_spill] sm:$0xff] %v5244_v41 }
 0x15d   :  { %6403 = vst [vmem:[#allocation7_spill] sm:$0xff] %v5128_v38  ;;  %2104 = vmatpush1.bf16.msra.mxu0 %v5118_v7  ;;  %v5138_v16 = vpack.c.bf16 %v667_v10, %v665_v19  ;;  %6409 = vst [vmem:[#allocation13_spill] sm:$0xff] %v5196_v33  ;;  %v5204_v19 = vld [vmem:[%s6354_s3 + $0x180] ss:$8 sps:$4 sm:$0xff]   ;;  %v5214_v10 = vld [vmem:[%s6354_s3 + $0x194] ss:$8 sps:$4 sm:$0xff]  }
 0x15e   :  { %6404 = vst [vmem:[#allocation8_spill] sm:$0xff] %v5130_v3  ;;  %2105 = vmatprep.subr.bf16.mxu0 %v5124_v51  ;;  %6410 = vst [vmem:[#allocation14_spill] sm:$0xff] %v5204_v19  ;;  %v5282_v38 = vld [vmem:[%s6354_s3 + $0x1c0] ss:$8 sps:$4 sm:$0xff]   ;;  %v5288_v3 = vld [vmem:[%s6354_s3 + $0x1d4] ss:$8 sps:$4 sm:$0xff]  }
 0x15f   :  { %6405 = vst [vmem:[#allocation9_spill] sm:$0xff] %v5138_v16  ;;  %6411 = vst [vmem:[#allocation15_spill] sm:$0xff] %v5214_v10 }
 0x160   :  { %6418 = vst [vmem:[#allocation22_spill] sm:$0xff] %v5282_v38  ;;  %6419 = vst [vmem:[#allocation23_spill] sm:$0xff] %v5288_v3 }
 0x161   :  { %2106 = vmatpush1.bf16.msra.mxu0 %v5136_v61 }
 0x162   :  { %2107 = vmatprep.subr.bf16.mxu0 %v5144_v43 }
 0x165   :  { %v5158_v32 = vpop.f32.mrb[36].mxu1  ;;  %2108 = vmatpush1.bf16.msra.mxu0 %v5150_v24 }
 0x166   :  { %v5168_v52 = vpop.f32.mrb[37].mxu1  ;;  %2109 = vmatprep.subr.bf16.mxu0 %v5156_v50 }
 0x167   :  { %v5178_v55 = vpop.f32.mrb[38].mxu1 }
 0x168   :  { %v5182_v6 = vpop.f32.mrb[39].mxu1 }
 0x169   :  { %2110 = vmatpush1.bf16.msra.mxu0 %v5164_v31 }
 0x16a   :  { %2111 = vmatprep.subr.bf16.mxu0 %v5174_v45 }
 0x16d   :  { %2112 = vmatpush1.bf16.msra.mxu0 %v5190_v37  ;;  %v5199_v49 = vpop.f32.mrb[40].mxu1 }
 0x16e   :  { %v5208_v9 = vpop.f32.mrb[41].mxu1  ;;  %2113 = vmatprep.subr.bf16.mxu0 %v5196_v33 }
 0x16f   :  { %v5218_v48 = vpop.f32.mrb[42].mxu1 }
 0x170   :  { %v5222_v4 = vpop.f32.mrb[43].mxu1 }
 0x171   :  { %2114 = vmatpush1.bf16.msra.mxu0 %v5204_v19 }
 0x172   :  { %2115 = vmatprep.subr.bf16.mxu0 %v5214_v10 }
 0x175   :  { %2116 = vmatpush1.bf16.msra.mxu0 %v5230_v28  ;;  %v5239_v15 = vpop.f32.mrb[44].mxu1 }
 0x176   :  { %v5248_v16 = vpop.f32.mrb[45].mxu1  ;;  %2117 = vmatprep.subr.bf16.mxu0 %v5236_v56  ;;  %v5270_v56 = vld [vmem:[%s6354_s3 + $0x1b0] ss:$8 sps:$4 sm:$0xff]  }
 0x177   :  { %v5258_v22 = vpop.f32.mrb[46].mxu1  ;;  %6416 = vst [vmem:[#allocation20_spill] sm:$0xff] %v5270_v56 }
 0x178   :  { %v5262_v58 = vpop.f32.mrb[47].mxu1 }
 0x179   :  { %2118 = vmatpush1.bf16.msra.mxu0 %v5244_v41  ;;  %v5318_v41 = vld [vmem:[%s6354_s3 + $0x1f0] ss:$8 sps:$4 sm:$0xff]  }
 0x17a   :  { %2119 = vmatprep.subr.bf16.mxu0 %v5254_v42  ;;  %v5294_v42 = vld [vmem:[%s6354_s3 + $0x1d0] ss:$8 sps:$4 sm:$0xff]  }
 0x17b   :  { %6420 = vst [vmem:[#allocation24_spill] sm:$0xff] %v5294_v42 }
 0x17d   :  { %2120 = vmatpush1.bf16.msra.mxu0 %v5270_v56  ;;  %v5300_v56 = vld [vmem:[%s6354_s3 + $0x1e4] ss:$8 sps:$4 sm:$0xff]  }
 0x17e   :  { %2121 = vmatprep.subr.bf16.mxu0 %v5276_v5  ;;  %6421 = vst [vmem:[#allocation25_spill] sm:$0xff] %v5300_v56  ;;  %v5306_v5 = vld [vmem:[%s6354_s3 + $0x1e0] ss:$8 sps:$4 sm:$0xff]  }
 0x17f   :  { %6422 = vst [vmem:[#allocation26_spill] sm:$0xff] %v5306_v5 }
 0x181   :  { %2122 = vmatpush1.bf16.msra.mxu0 %v5282_v38  ;;  %v5312_v38 = vld [vmem:[%s6354_s3 + $0x1f4] ss:$8 sps:$4 sm:$0xff]  }
 0x182   :  { %2123 = vmatprep.subr.bf16.mxu0 %v5288_v3  ;;  %6423 = vst [vmem:[#allocation27_spill] sm:$0xff] %v5312_v38 }
 0x185   :  { %2124 = vmatpush1.bf16.msra.mxu0 %v5294_v42 }
 0x186   :  { %2125 = vmatprep.subr.bf16.mxu0 %v5300_v56  ;;  %v5325_v56 = vld [vmem:[%s6354_s3 + $0x204] ss:$8 sps:$4 sm:$0xff]  }
 0x189   :  { %v977_v3 = vpop.f32.mrb[48].mxu1  ;;  %2126 = vmatpush1.bf16.msra.mxu0 %v5306_v5  ;;  %v6424_v5 = vmax.f32 %v4928_v60, %v5158_v32 }
 0x18a   :  { %v1018_v42 = vmax.f32 %v5003_v62, %v977_v3  ;;  %v979_v28 = vpop.f32.mrb[49].mxu1  ;;  %2127 = vmatprep.subr.bf16.mxu0 %v5312_v38  ;;  %v6425_v62 = vmax.f32 %v4931_v63, %v5168_v52 }
 0x18b   :  { %v1019_v10 = vmax.f32 %v5006_v21, %v979_v28  ;;  %v981_v19 = vpop.f32.mrb[50].mxu1  ;;  %v6426_v21 = vmax.f32 %v4934_v1, %v5178_v55 }
 0x18c   :  { %v1030_v33 = vmax.f32 %v6424_v5, %v1018_v42  ;;  %v1020_v37 = vmax.f32 %v5009_v29, %v981_v19  ;;  %v983_v45 = vpop.f32.mrb[51].mxu1  ;;  %v6427_v29 = vmax.f32 %v4936_v2, %v5182_v6  ;;  %v6428_v2 = vmax.f32 %v4948_v8, %v5199_v49 }
 0x18d   :  { %v1031_v3 = vmax.f32 %v6425_v62, %v1019_v10  ;;  %v1021_v38 = vmax.f32 %v5012_v18, %v983_v45  ;;  %2128 = vmatpush1.bf16.msra.mxu0 %v5318_v41  ;;  %v6430_v8 = vmax.f32 %v4958_v13, %v5218_v48 }
 0x18e   :  { %v1042_v31 = vadd.f32 %v1030_v33, %v4996_v35  ;;  %v1032_v28 = vmax.f32 %v6426_v21, %v1020_v37  ;;  %2150 = vmatprep.subr.bf16.mxu0 %v5325_v56 }
 0x18f   :  { %v1043_v60 = vadd.f32 %v1031_v3, %v5001_v57  ;;  %v1033_v42 = vmax.f32 %v6427_v29, %v1021_v38 }
 0x190   :  { %v1044_v63 = vadd.f32 %v1032_v28, %v4996_v35  ;;  %v1054_v32 = vmax.f32 %v1042_v31, 0.0  ;;  %v6429_v31 = vmax.f32 %v4954_v11, %v5208_v9 }
 0x191   :  { %v1045_v18 = vadd.f32 %v1033_v42, %v5001_v57  ;;  %v987_v5 = vpop.f32.mrb[52].mxu1  ;;  %v1055_v1 = vmax.f32 %v1043_v60, 0.0 }
 0x192   :  { %v1056_v52 = vmax.f32 %v1044_v63, 0.0  ;;  %v1022_v45 = vmax.f32 %v5019_v27, %v987_v5  ;;  %v989_v33 = vpop.f32.mrb[53].mxu1 }
 0x193   :  { %v1057_v55 = vmax.f32 %v1045_v18, 0.0  ;;  %v1023_v37 = vmax.f32 %v5022_v39, %v989_v33  ;;  %v991_v19 = vpop.f32.mrb[54].mxu1  ;;  %v5361_v39 = vld [vmem:[%s6354_s3 + $0x200] ss:$8 sps:$4 sm:$0xff]  }
 0x194   :  { %v1228_v10 = vpack.c.bf16 %v1056_v52, %v1054_v32  ;;  %v1034_v38 = vmax.f32 %v6428_v2, %v1022_v45  ;;  %v1024_v6 = vmax.f32 %v5033_v30, %v991_v19  ;;  %v993_v62 = vpop.f32.mrb[55].mxu1  ;;  %v5370_v30 = vld [vmem:[%s6354_s3 + $0x214] ss:$8 sps:$4 sm:$0xff]  }
 0x195   :  { %v1035_v3 = vmax.f32 %v6429_v31, %v1023_v37  ;;  %v1025_v27 = vmax.f32 %v5044_v46, %v993_v62  ;;  %v1229_v21 = vpack.c.bf16 %v1057_v55, %v1055_v1  ;;  %v6431_v46 = vmax.f32 %v4960_v14, %v5222_v4  ;;  %v5383_v14 = vld [vmem:[%s6354_s3 + $0x210] ss:$8 sps:$4 sm:$0xff]  }
 0x196   :  { %v1046_v28 = vadd.f32 %v1034_v38, %v4996_v35  ;;  %v1036_v49 = vmax.f32 %v6430_v8, %v1024_v6  ;;  %v5523_v8 = vld [vmem:[%s6354_s3 + $0x280] ss:$8 sps:$4 sm:$0xff]  }
 0x197   :  { %v1047_v11 = vadd.f32 %v1035_v3, %v5001_v57  ;;  %v1037_v9 = vmax.f32 %v6431_v46, %v1025_v27  ;;  %2129 = vmatprep.mubr.bf16.mxu0 %v1229_v21  ;;  %2343 = vmatprep.mubr.bf16.mxu1 %v1229_v21  ;;  %v6436_v27 = vld [vmem:[#allocation10_spill] sm:$0xff]  ;;  %v6437_v21 = vld [vmem:[#allocation11_spill] sm:$0xff] }
 0x198   :  { %v1058_v60 = vmax.f32 %v1046_v28, 0.0  ;;  %v1048_v29 = vadd.f32 %v1036_v49, %v4996_v35  ;;  %2130 = vmatmul.mubr.bf16.vlgmr.msra.gmra.mrb[36].mxu0 %v1228_v10  ;;  %2344 = vmatmul.mubr.bf16.vlgmr.msra.gmra.mrb[60].mxu1 %v1228_v10  ;;  %v6438_v28 = vld [vmem:[#allocation12_spill] sm:$0xff]  ;;  %v6439_v49 = vld [vmem:[#allocation13_spill] sm:$0xff]  ;;  %v6440_v46 = vld [vmem:[#allocation14_spill] sm:$0xff] }
 0x199   :  { %v1059_v13 = vmax.f32 %v1047_v11, 0.0  ;;  %v1049_v48 = vadd.f32 %v1037_v9, %v5001_v57  ;;  %2151 = vmatpush1.bf16.msra.mxu0 %v5361_v39  ;;  %2365 = vmatpush1.bf16.msra.mxu1 %v5031_v44  ;;  %v997_v42 = vpop.f32.mrb[56].mxu1  ;;  %v5393_v44 = vld [vmem:[%s6354_s3 + $0x224] ss:$8 sps:$4 sm:$0xff]   ;;  %v5530_v11 = vld [vmem:[%s6354_s3 + $0x294] ss:$8 sps:$4 sm:$0xff]  }
 0x19a   :  { %v5385_v4 = vpack.c.bf16 %v1058_v60, %v1056_v52  ;;  %v1060_v63 = vmax.f32 %v1048_v29, 0.0  ;;  %v1026_v18 = vmax.f32 %v5068_v34, %v997_v42  ;;  %v999_v5 = vpop.f32.mrb[57].mxu1  ;;  %2152 = vmatprep.subr.bf16.mxu0 %v5370_v30  ;;  %2366 = vmatprep.subr.bf16.mxu1 %v5042_v40  ;;  %v6432_v52 = vmax.f32 %v4972_v20, %v5239_v15  ;;  %v5415_v20 = vld [vmem:[%s6354_s3 + $0x220] ss:$8 sps:$4 sm:$0xff]   ;;  %v5537_v9 = vld [vmem:[%s6354_s3 + $0x290] ss:$8 sps:$4 sm:$0xff]  }
 0x19b   :  { %v1061_v32 = vmax.f32 %v1049_v48, 0.0  ;;  %v1027_v45 = vmax.f32 %v5078_v36, %v999_v5  ;;  %v1001_v33 = vpop.f32.mrb[58].mxu1  ;;  %v5396_v1 = vpack.c.bf16 %v1059_v13, %v1057_v55  ;;  %v6433_v40 = vmax.f32 %v4978_v23, %v5248_v16  ;;  %v5432_v55 = vld [vmem:[%s6354_s3 + $0x234] ss:$8 sps:$4 sm:$0xff]   ;;  %v5544_v29 = vld [vmem:[%s6354_s3 + $0x2a4] ss:$8 sps:$4 sm:$0xff]  }
 0x19c   :  { %v1038_v34 = vmax.f32 %v6432_v52, %v1026_v18  ;;  %v1028_v37 = vmax.f32 %v5092_v53, %v1001_v33  ;;  %v1003_v19 = vpop.f32.mrb[59].mxu1  ;;  %v5402_v10 = vpack.c.bf16 %v1060_v63, %v1058_v60  ;;  %v6434_v15 = vmax.f32 %v4982_v25, %v5258_v22  ;;  %v6441_v60 = vld [vmem:[#allocation15_spill] sm:$0xff]  ;;  %v6443_v42 = vld [vmem:[#allocation17_spill] sm:$0xff]  ;;  %v6444_v18 = vld [vmem:[#allocation18_spill] sm:$0xff] }
 0x19d   :  { %v1039_v2 = vmax.f32 %v6433_v40, %v1027_v45  ;;  %v1029_v38 = vmax.f32 %v5104_v17, %v1003_v19  ;;  %2153 = vmatpush1.bf16.msra.mxu0 %v5383_v14  ;;  %2367 = vmatpush1.bf16.msra.mxu1 %v5056_v59  ;;  %v5410_v36 = vpack.c.bf16 %v1061_v32, %v1059_v13  ;;  %v6442_v13 = vld [vmem:[#allocation16_spill] sm:$0xff]  ;;  %v5551_v48 = vld [vmem:[%s6354_s3 + $0x2a0] ss:$8 sps:$4 sm:$0xff]   ;;  %v5572_v45 = vld [vmem:[%s6354_s3 + $0x2c4] ss:$8 sps:$4 sm:$0xff]  }
 0x19e   :  { %v1050_v53 = vadd.f32 %v1038_v34, %v4996_v35  ;;  %v1040_v23 = vmax.f32 %v6434_v15, %v1028_v37  ;;  %2154 = vmatprep.subr.bf16.mxu0 %v5393_v44  ;;  %2368 = vmatprep.subr.bf16.mxu1 %v5065_v12  ;;  %v6435_v59 = vmax.f32 %v4984_v26, %v5262_v58  ;;  %v5443_v58 = vld [vmem:[%s6354_s3 + $0x230] ss:$8 sps:$4 sm:$0xff]   ;;  %v5579_v52 = vld [vmem:[%s6354_s3 + $0x2c0] ss:$8 sps:$4 sm:$0xff]   ;;  %v5586_v37 = vld [vmem:[%s6354_s3 + $0x2d4] ss:$8 sps:$4 sm:$0xff]  }
 0x19f   :  { %v1051_v17 = vadd.f32 %v1039_v2, %v5001_v57  ;;  %2139 = vmatprep.mubr.bf16.mxu0 %v5410_v36  ;;  %2353 = vmatprep.mubr.bf16.mxu1 %v5410_v36  ;;  %v5565_v5 = vld [vmem:[%s6354_s3 + $0x2b0] ss:$8 sps:$4 sm:$0xff]   ;;  %v6448_v19 = vld [vmem:[#allocation22_spill] sm:$0xff]  ;;  %v6449_v2 = vld [vmem:[#allocation23_spill] sm:$0xff] }
 0x1a0   :  { %v1041_v16 = vmax.f32 %v6435_v59, %v1029_v38  ;;  %v1062_v25 = vmax.f32 %v1050_v53, 0.0  ;;  %v1052_v22 = vadd.f32 %v1040_v23, %v4996_v35  ;;  %2140 = vmatmul.mubr.bf16.gmra.mrb[40].mxu0 %v5402_v10  ;;  %2354 = vmatmul.mubr.bf16.gmra.mrb[64].mxu1 %v5402_v10  ;;  %v5450_v35 = vld [vmem:[%s6354_s3 + $0x244] ss:$8 sps:$4 sm:$0xff]   ;;  %v6446_v33 = vld [vmem:[#allocation20_spill] sm:$0xff]  ;;  %v6447_v34 = vld [vmem:[#allocation21_spill] sm:$0xff] }
 0x1a1   :  { %v1063_v12 = vmax.f32 %v1051_v17, 0.0  ;;  %2155 = vmatpush1.bf16.msra.mxu0 %v5415_v20  ;;  %2369 = vmatpush1.bf16.msra.mxu1 %v5090_v47  ;;  %v5593_v40 = vld [vmem:[%s6354_s3 + $0x2d0] ss:$8 sps:$4 sm:$0xff]   ;;  %v5600_v38 = vld [vmem:[%s6354_s3 + $0x2e4] ss:$8 sps:$4 sm:$0xff]  }
 0x1a2   :  { %v1053_v26 = vadd.f32 %v1041_v16, %v5001_v57  ;;  %v1064_v6 = vmax.f32 %v1052_v22, 0.0  ;;  %2182 = vmatprep.mubr.bf16.mxu0 %v5070_v0  ;;  %2396 = vmatprep.mubr.bf16.mxu1 %v5070_v0  ;;  %v5452_v57 = vpack.c.bf16 %v1062_v25, %v1060_v63  ;;  %v5465_v0 = vld [vmem:[%s6354_s3 + $0x240] ss:$8 sps:$4 sm:$0xff]   ;;  %v5558_v63 = vld [vmem:[%s6354_s3 + $0x2b4] ss:$8 sps:$4 sm:$0xff]  }
 0x1a3   :  { %2156 = vmatprep.subr.bf16.mxu0 %v5432_v55  ;;  %2370 = vmatprep.subr.bf16.mxu1 %v5102_v54  ;;  %v5456_v47 = vpack.c.bf16 %v1063_v12, %v1061_v32  ;;  %v5474_v54 = vld [vmem:[%s6354_s3 + $0x254] ss:$8 sps:$4 sm:$0xff]   ;;  %v6445_v32 = vld [vmem:[#allocation19_spill] sm:$0xff]  ;;  %v6452_v59 = vld [vmem:[#allocation26_spill] sm:$0xff] }
 0x1a4   :  { %v1065_v62 = vmax.f32 %v1053_v26, 0.0  ;;  %v5458_v31 = vpack.c.bf16 %v1064_v6, %v1062_v25  ;;  %v6450_v53 = vld [vmem:[#allocation24_spill] sm:$0xff]  ;;  %v5607_v15 = vld [vmem:[%s6354_s3 + $0x2e0] ss:$8 sps:$4 sm:$0xff]   ;;  %v6451_v23 = vld [vmem:[#allocation25_spill] sm:$0xff] }
 0x1a5   :  { %2157 = vmatpush1.bf16.msra.mxu0 %v5443_v58  ;;  %2371 = vmatpush1.bf16.msra.mxu1 %v5118_v7  ;;  %v5481_v7 = vld [vmem:[%s6354_s3 + $0x250] ss:$8 sps:$4 sm:$0xff]   ;;  %v5614_v17 = vld [vmem:[%s6354_s3 + $0x2f4] ss:$8 sps:$4 sm:$0xff]   ;;  %v6453_v25 = vld [vmem:[#allocation27_spill] sm:$0xff] }
 0x1a6   :  { %v5467_v3 = vpack.c.bf16 %v1065_v62, %v1063_v12  ;;  %2158 = vmatprep.subr.bf16.mxu0 %v5450_v35  ;;  %2372 = vmatprep.subr.bf16.mxu1 %v5124_v51  ;;  %v5488_v51 = vld [vmem:[%s6354_s3 + $0x264] ss:$8 sps:$4 sm:$0xff]   ;;  %v5621_v16 = vld [vmem:[%s6354_s3 + $0x2f0] ss:$8 sps:$4 sm:$0xff]   ;;  %v5635_v12 = vld [vmem:[%s6354_s3 + $0x300] ss:$8 sps:$4 sm:$0xff]  }
 0x1a7   :  { %v5628_v22 = vld [vmem:[%s6354_s3 + $0x304] ss:$8 sps:$4 sm:$0xff]   ;;  %v5642_v26 = vld [vmem:[%s6354_s3 + $0x314] ss:$8 sps:$4 sm:$0xff]  }
 0x1a8   :  { %v6454_v6 = vld [vmem:[#allocation3_spill] sm:$0xff] }
 0x1a9   :  { %2159 = vmatpush1.bf16.msra.mxu0 %v5465_v0  ;;  %2373 = vmatpush1.bf16.msra.mxu1 %v5136_v61  ;;  %v5495_v61 = vld [vmem:[%s6354_s3 + $0x260] ss:$8 sps:$4 sm:$0xff]  }
 0x1aa   :  { %2160 = vmatprep.subr.bf16.mxu0 %v5474_v54  ;;  %2374 = vmatprep.subr.bf16.mxu1 %v5144_v43  ;;  %v5502_v43 = vld [vmem:[%s6354_s3 + $0x274] ss:$8 sps:$4 sm:$0xff]   ;;  %v6455_v62 = vld [vmem:[#allocation7_spill] sm:$0xff] }
 0x1ad   :  { %2161 = vmatpush1.bf16.msra.mxu0 %v5481_v7  ;;  %2375 = vmatpush1.bf16.msra.mxu1 %v5150_v24  ;;  %v5509_v24 = vld [vmem:[%s6354_s3 + $0x270] ss:$8 sps:$4 sm:$0xff]  }
 0x1ae   :  { %2162 = vmatprep.subr.bf16.mxu0 %v5488_v51  ;;  %2376 = vmatprep.subr.bf16.mxu1 %v5156_v50  ;;  %v5516_v50 = vld [vmem:[%s6354_s3 + $0x284] ss:$8 sps:$4 sm:$0xff]  }
 0x1b1   :  { %2163 = vmatpush1.bf16.msra.mxu0 %v5495_v61  ;;  %2377 = vmatpush1.bf16.msra.mxu1 %v6436_v27  ;;  %v5666_v27 = vld [vmem:[%s6354_s3 + $0x320] ss:$8 sps:$4 sm:$0xff]  }
 0x1b2   :  { %2164 = vmatprep.subr.bf16.mxu0 %v5502_v43  ;;  %2378 = vmatprep.subr.bf16.mxu1 %v6437_v21  ;;  %v6456_v21 = vld [vmem:[#allocation6_spill] sm:$0xff] }
 0x1b5   :  { %2165 = vmatpush1.bf16.msra.mxu0 %v5509_v24  ;;  %2379 = vmatpush1.bf16.msra.mxu1 %v6438_v28  ;;  %v5796_v28 = vld [vmem:[%s6354_s3 + $0x3b0] ss:$8 sps:$4 sm:$0xff]  }
 0x1b6   :  { %2166 = vmatprep.subr.bf16.mxu0 %v5516_v50  ;;  %2380 = vmatprep.subr.bf16.mxu1 %v6439_v49  ;;  %v5810_v49 = vld [vmem:[%s6354_s3 + $0x3c0] ss:$8 sps:$4 sm:$0xff]  }
 0x1b9   :  { %2167 = vmatpush1.bf16.msra.mxu0 %v5523_v8  ;;  %2381 = vmatpush1.bf16.msra.mxu1 %v6440_v46  ;;  %v5824_v46 = vld [vmem:[%s6354_s3 + $0x3d0] ss:$8 sps:$4 sm:$0xff]  }
 0x1ba   :  { %2168 = vmatprep.subr.bf16.mxu0 %v5530_v11  ;;  %2382 = vmatprep.subr.bf16.mxu1 %v6441_v60  ;;  %v5838_v60 = vld [vmem:[%s6354_s3 + $0x3e0] ss:$8 sps:$4 sm:$0xff]  }
 0x1bd   :  { %2169 = vmatpush1.bf16.msra.mxu0 %v5537_v9  ;;  %2383 = vmatpush1.bf16.msra.mxu1 %v6442_v13  ;;  %v5852_v13 = vld [vmem:[%s6354_s3 + $0x3f0] ss:$8 sps:$4 sm:$0xff]  }
 0x1be   :  { %2170 = vmatprep.subr.bf16.mxu0 %v5544_v29  ;;  %2384 = vmatprep.subr.bf16.mxu1 %v6443_v42  ;;  %v5867_v42 = vld [vmem:[%s6354_s3 + $0x400] ss:$8 sps:$4 sm:$0xff]  }
 0x1c1   :  { %2171 = vmatpush1.bf16.msra.mxu0 %v5551_v48  ;;  %2385 = vmatpush1.bf16.msra.mxu1 %v6444_v18  ;;  %v5884_v18 = vld [vmem:[%s6354_s3 + $0x410] ss:$8 sps:$4 sm:$0xff]  }
 0x1c2   :  { %2172 = vmatprep.subr.bf16.mxu0 %v5558_v63  ;;  %2386 = vmatprep.subr.bf16.mxu1 %v6445_v32  ;;  %v6457_v32 = vld [vmem:[#allocation5_spill] sm:$0xff] }
 0x1c5   :  { %2173 = vmatpush1.bf16.msra.mxu0 %v5565_v5  ;;  %2387 = vmatpush1.bf16.msra.mxu1 %v6446_v33  ;;  %v5923_v33 = vld [vmem:[%s6354_s3 + $0x444] ss:$8 sps:$4 sm:$0xff]  }
 0x1c6   :  { %2174 = vmatprep.subr.bf16.mxu0 %v5572_v45  ;;  %2388 = vmatprep.subr.bf16.mxu1 %v6447_v34  ;;  %v5944_v34 = vld [vmem:[%s6354_s3 + $0x450] ss:$8 sps:$4 sm:$0xff]  }
 0x1c9   :  { %2175 = vmatpush1.bf16.msra.mxu0 %v5579_v52  ;;  %2389 = vmatpush1.bf16.msra.mxu1 %v6448_v19  ;;  %v5958_v19 = vld [vmem:[%s6354_s3 + $0x460] ss:$8 sps:$4 sm:$0xff]  }
 0x1ca   :  { %2176 = vmatprep.subr.bf16.mxu0 %v5586_v37  ;;  %2390 = vmatprep.subr.bf16.mxu1 %v6449_v2  ;;  %v5972_v2 = vld [vmem:[%s6354_s3 + $0x470] ss:$8 sps:$4 sm:$0xff]  }
 0x1cd   :  { %2177 = vmatpush1.bf16.msra.mxu0 %v5593_v40  ;;  %2391 = vmatpush1.bf16.msra.mxu1 %v6450_v53  ;;  %v5986_v53 = vld [vmem:[%s6354_s3 + $0x480] ss:$8 sps:$4 sm:$0xff]  }
 0x1ce   :  { %2178 = vmatprep.subr.bf16.mxu0 %v5600_v38  ;;  %2392 = vmatprep.subr.bf16.mxu1 %v6451_v23  ;;  %v6000_v23 = vld [vmem:[%s6354_s3 + $0x490] ss:$8 sps:$4 sm:$0xff]  }
 0x1d1   :  { %2179 = vmatpush1.bf16.msra.mxu0 %v5607_v15  ;;  %2393 = vmatpush1.bf16.msra.mxu1 %v6452_v59  ;;  %v6014_v59 = vld [vmem:[%s6354_s3 + $0x4a0] ss:$8 sps:$4 sm:$0xff]  }
 0x1d2   :  { %2180 = vmatprep.subr.bf16.mxu0 %v5614_v17  ;;  %2394 = vmatprep.subr.bf16.mxu1 %v6453_v25  ;;  %v4028_v25 = vld [vmem:[%s6354_s3 + $0x4b0] ss:$8 sps:$4 sm:$0xff]  }
 0x1d5   :  { %2181 = vmatpush1.bf16.msra.mxu0 %v5621_v16  ;;  %2395 = vmatpush1.bf16.msra.mxu1 %v5318_v41  ;;  %v5651_v41 = vld [vmem:[%s6354_s3 + $0x310] ss:$8 sps:$4 sm:$0xff]  }
 0x1d6   :  { %2203 = vmatprep.subr.bf16.mxu0 %v5628_v22  ;;  %2417 = vmatprep.subr.bf16.mxu1 %v5325_v56  ;;  %v5658_v56 = vld [vmem:[%s6354_s3 + $0x324] ss:$8 sps:$4 sm:$0xff]  }
 0x1d8   :  { %2183 = vmatmul.mubr.bf16.vlgmr.msra.gmra.mrb[36].mxu0 %v6454_v6  ;;  %2397 = vmatmul.mubr.bf16.vlgmr.msra.gmra.mrb[60].mxu1 %v6454_v6  ;;  %v4034_v6 = vld [vmem:[%s6354_s3 + $0x4d0] ss:$8 sps:$4 sm:$0xff]  }
 0x1d9   :  { %2192 = vmatprep.mubr.bf16.mxu0 %v6455_v62  ;;  %2204 = vmatpush1.bf16.msra.mxu0 %v5635_v12 }
 0x1da   :  { %2406 = vmatprep.mubr.bf16.mxu1 %v6455_v62  ;;  %2418 = vmatpush1.bf16.msra.mxu1 %v5361_v39  ;;  %v5674_v39 = vld [vmem:[%s6354_s3 + $0x334] ss:$8 sps:$4 sm:$0xff]   ;;  %v4039_v62 = vld [vmem:[%s6354_s3 + $0x4e4] ss:$8 sps:$4 sm:$0xff]  }
 0x1db   :  { %2205 = vmatprep.subr.bf16.mxu0 %v5642_v26  ;;  %2419 = vmatprep.subr.bf16.mxu1 %v5370_v30  ;;  %v5683_v30 = vld [vmem:[%s6354_s3 + $0x330] ss:$8 sps:$4 sm:$0xff]  }
 0x1dd   :  { %2206 = vmatpush1.bf16.msra.mxu0 %v5651_v41 }
 0x1de   :  { %2420 = vmatpush1.bf16.msra.mxu1 %v5383_v14  ;;  %2207 = vmatprep.subr.bf16.mxu0 %v5658_v56  ;;  %v5690_v14 = vld [vmem:[%s6354_s3 + $0x344] ss:$8 sps:$4 sm:$0xff]  }
 0x1df   :  { %2421 = vmatprep.subr.bf16.mxu1 %v5393_v44  ;;  %v5698_v44 = vld [vmem:[%s6354_s3 + $0x340] ss:$8 sps:$4 sm:$0xff]  }
 0x1e0   :  { %2193 = vmatmul.mubr.bf16.gmra.mrb[40].mxu0 %v6456_v21  ;;  %2407 = vmatmul.mubr.bf16.gmra.mrb[64].mxu1 %v6456_v21  ;;  %v6459_v21 = vld [vmem:[#allocation9_spill] sm:$0xff] }
 0x1e1   :  { %2208 = vmatpush1.bf16.msra.mxu0 %v5666_v27  ;;  %2235 = vmatprep.mubr.bf16.mxu0 %v5396_v1 }
 0x1e2   :  { %2422 = vmatpush1.bf16.msra.mxu1 %v5415_v20  ;;  %2449 = vmatprep.mubr.bf16.mxu1 %v5396_v1  ;;  %v5705_v1 = vld [vmem:[%s6354_s3 + $0x354] ss:$8 sps:$4 sm:$0xff]   ;;  %v5712_v20 = vld [vmem:[%s6354_s3 + $0x350] ss:$8 sps:$4 sm:$0xff]  }
 0x1e3   :  { %2209 = vmatprep.subr.bf16.mxu0 %v5674_v39  ;;  %2423 = vmatprep.subr.bf16.mxu1 %v5432_v55  ;;  %v5719_v55 = vld [vmem:[%s6354_s3 + $0x364] ss:$8 sps:$4 sm:$0xff]  }
 0x1e5   :  { %2210 = vmatpush1.bf16.msra.mxu0 %v5683_v30 }
 0x1e6   :  { %2424 = vmatpush1.bf16.msra.mxu1 %v5443_v58  ;;  %2211 = vmatprep.subr.bf16.mxu0 %v5690_v14  ;;  %v5726_v58 = vld [vmem:[%s6354_s3 + $0x360] ss:$8 sps:$4 sm:$0xff]  }
 0x1e7   :  { %2425 = vmatprep.subr.bf16.mxu1 %v5450_v35  ;;  %v5733_v35 = vld [vmem:[%s6354_s3 + $0x374] ss:$8 sps:$4 sm:$0xff]  }
 0x1e9   :  { %2212 = vmatpush1.bf16.msra.mxu0 %v5698_v44 }
 0x1ea   :  { %2426 = vmatpush1.bf16.msra.mxu1 %v5465_v0  ;;  %2213 = vmatprep.subr.bf16.mxu0 %v5705_v1  ;;  %v5740_v0 = vld [vmem:[%s6354_s3 + $0x370] ss:$8 sps:$4 sm:$0xff]  }
 0x1eb   :  { %2427 = vmatprep.subr.bf16.mxu1 %v5474_v54  ;;  %v5747_v54 = vld [vmem:[%s6354_s3 + $0x384] ss:$8 sps:$4 sm:$0xff]  }
 0x1ed   :  { %2214 = vmatpush1.bf16.msra.mxu0 %v5712_v20 }
 0x1ee   :  { %2428 = vmatpush1.bf16.msra.mxu1 %v5481_v7  ;;  %2215 = vmatprep.subr.bf16.mxu0 %v5719_v55  ;;  %v5754_v7 = vld [vmem:[%s6354_s3 + $0x380] ss:$8 sps:$4 sm:$0xff]  }
 0x1ef   :  { %2429 = vmatprep.subr.bf16.mxu1 %v5488_v51  ;;  %v5761_v51 = vld [vmem:[%s6354_s3 + $0x394] ss:$8 sps:$4 sm:$0xff]  }
 0x1f1   :  { %2216 = vmatpush1.bf16.msra.mxu0 %v5726_v58 }
 0x1f2   :  { %2430 = vmatpush1.bf16.msra.mxu1 %v5495_v61  ;;  %2217 = vmatprep.subr.bf16.mxu0 %v5733_v35  ;;  %v5768_v61 = vld [vmem:[%s6354_s3 + $0x390] ss:$8 sps:$4 sm:$0xff]  }
 0x1f3   :  { %2431 = vmatprep.subr.bf16.mxu1 %v5502_v43  ;;  %v5775_v43 = vld [vmem:[%s6354_s3 + $0x3a4] ss:$8 sps:$4 sm:$0xff]  }
 0x1f5   :  { %2218 = vmatpush1.bf16.msra.mxu0 %v5740_v0 }
 0x1f6   :  { %2432 = vmatpush1.bf16.msra.mxu1 %v5509_v24  ;;  %2219 = vmatprep.subr.bf16.mxu0 %v5747_v54  ;;  %v5782_v24 = vld [vmem:[%s6354_s3 + $0x3a0] ss:$8 sps:$4 sm:$0xff]  }
 0x1f7   :  { %2433 = vmatprep.subr.bf16.mxu1 %v5516_v50  ;;  %v5789_v50 = vld [vmem:[%s6354_s3 + $0x3b4] ss:$8 sps:$4 sm:$0xff]  }
 0x1f9   :  { %2220 = vmatpush1.bf16.msra.mxu0 %v5754_v7 }
 0x1fa   :  { %2434 = vmatpush1.bf16.msra.mxu1 %v5523_v8  ;;  %2221 = vmatprep.subr.bf16.mxu0 %v5761_v51  ;;  %v5803_v8 = vld [vmem:[%s6354_s3 + $0x3c4] ss:$8 sps:$4 sm:$0xff]  }
 0x1fb   :  { %2435 = vmatprep.subr.bf16.mxu1 %v5530_v11  ;;  %v5817_v11 = vld [vmem:[%s6354_s3 + $0x3d4] ss:$8 sps:$4 sm:$0xff]  }
 0x1fd   :  { %2222 = vmatpush1.bf16.msra.mxu0 %v5768_v61 }
 0x1fe   :  { %2436 = vmatpush1.bf16.msra.mxu1 %v5537_v9  ;;  %2223 = vmatprep.subr.bf16.mxu0 %v5775_v43  ;;  %v5831_v9 = vld [vmem:[%s6354_s3 + $0x3e4] ss:$8 sps:$4 sm:$0xff]  }
 0x1ff   :  { %2437 = vmatprep.subr.bf16.mxu1 %v5544_v29  ;;  %v5845_v29 = vld [vmem:[%s6354_s3 + $0x3f4] ss:$8 sps:$4 sm:$0xff]  }
 0x201   :  { %2224 = vmatpush1.bf16.msra.mxu0 %v5782_v24 }
 0x202   :  { %2438 = vmatpush1.bf16.msra.mxu1 %v5551_v48  ;;  %2225 = vmatprep.subr.bf16.mxu0 %v5789_v50  ;;  %v5859_v48 = vld [vmem:[%s6354_s3 + $0x404] ss:$8 sps:$4 sm:$0xff]  }
 0x203   :  { %2439 = vmatprep.subr.bf16.mxu1 %v5558_v63  ;;  %v5874_v63 = vld [vmem:[%s6354_s3 + $0x414] ss:$8 sps:$4 sm:$0xff]  }
 0x205   :  { %2226 = vmatpush1.bf16.msra.mxu0 %v5796_v28 }
 0x206   :  { %2440 = vmatpush1.bf16.msra.mxu1 %v5565_v5  ;;  %2227 = vmatprep.subr.bf16.mxu0 %v5803_v8  ;;  %v5891_v5 = vld [vmem:[%s6354_s3 + $0x424] ss:$8 sps:$4 sm:$0xff]  }
 0x207   :  { %2441 = vmatprep.subr.bf16.mxu1 %v5572_v45  ;;  %v5916_v45 = vld [vmem:[%s6354_s3 + $0x430] ss:$8 sps:$4 sm:$0xff]  }
 0x209   :  { %2228 = vmatpush1.bf16.msra.mxu0 %v5810_v49 }
 0x20a   :  { %2442 = vmatpush1.bf16.msra.mxu1 %v5579_v52  ;;  %2229 = vmatprep.subr.bf16.mxu0 %v5817_v11  ;;  %v5937_v52 = vld [vmem:[%s6354_s3 + $0x454] ss:$8 sps:$4 sm:$0xff]  }
 0x20b   :  { %2443 = vmatprep.subr.bf16.mxu1 %v5586_v37  ;;  %v5951_v37 = vld [vmem:[%s6354_s3 + $0x464] ss:$8 sps:$4 sm:$0xff]  }
 0x20d   :  { %2230 = vmatpush1.bf16.msra.mxu0 %v5824_v46 }
 0x20e   :  { %2444 = vmatpush1.bf16.msra.mxu1 %v5593_v40  ;;  %2231 = vmatprep.subr.bf16.mxu0 %v5831_v9  ;;  %v5965_v40 = vld [vmem:[%s6354_s3 + $0x474] ss:$8 sps:$4 sm:$0xff]  }
 0x20f   :  { %2445 = vmatprep.subr.bf16.mxu1 %v5600_v38  ;;  %v5979_v38 = vld [vmem:[%s6354_s3 + $0x484] ss:$8 sps:$4 sm:$0xff]  }
 0x211   :  { %2232 = vmatpush1.bf16.msra.mxu0 %v5838_v60 }
 0x212   :  { %2446 = vmatpush1.bf16.msra.mxu1 %v5607_v15  ;;  %2233 = vmatprep.subr.bf16.mxu0 %v5845_v29  ;;  %v5993_v15 = vld [vmem:[%s6354_s3 + $0x494] ss:$8 sps:$4 sm:$0xff]  }
 0x213   :  { %2447 = vmatprep.subr.bf16.mxu1 %v5614_v17  ;;  %v6007_v17 = vld [vmem:[%s6354_s3 + $0x4a4] ss:$8 sps:$4 sm:$0xff]  }
 0x215   :  { %2234 = vmatpush1.bf16.msra.mxu0 %v5852_v13 }
 0x216   :  { %2448 = vmatpush1.bf16.msra.mxu1 %v5621_v16  ;;  %2256 = vmatprep.subr.bf16.mxu0 %v5859_v48  ;;  %v4030_v16 = vld [vmem:[%s6354_s3 + $0x4b4] ss:$8 sps:$4 sm:$0xff]  }
 0x217   :  { %2470 = vmatprep.subr.bf16.mxu1 %v5628_v22  ;;  %v4033_v22 = vld [vmem:[%s6354_s3 + $0x4c4] ss:$8 sps:$4 sm:$0xff]  }
 0x218   :  { %2236 = vmatmul.mubr.bf16.vlgmr.msra.gmra.mrb[36].mxu0 %v5385_v4 }
 0x219   :  { %2450 = vmatmul.mubr.bf16.vlgmr.msra.gmra.mrb[60].mxu1 %v5385_v4  ;;  %2245 = vmatprep.mubr.bf16.mxu0 %v5456_v47  ;;  %v5898_v4 = vld [vmem:[%s6354_s3 + $0x420] ss:$8 sps:$4 sm:$0xff]  }
 0x21a   :  { %2257 = vmatpush1.bf16.msra.mxu0 %v5867_v42  ;;  %2459 = vmatprep.mubr.bf16.mxu1 %v5456_v47  ;;  %v5905_v47 = vld [vmem:[%s6354_s3 + $0x434] ss:$8 sps:$4 sm:$0xff]  }
 0x21b   :  { %2471 = vmatpush1.bf16.msra.mxu1 %v5635_v12  ;;  %2258 = vmatprep.subr.bf16.mxu0 %v5874_v63  ;;  %v4031_v12 = vld [vmem:[%s6354_s3 + $0x4c0] ss:$8 sps:$4 sm:$0xff]  }
 0x21c   :  { %2472 = vmatprep.subr.bf16.mxu1 %v5642_v26  ;;  %v4036_v26 = vld [vmem:[%s6354_s3 + $0x4d4] ss:$8 sps:$4 sm:$0xff]  }
 0x21e   :  { %2259 = vmatpush1.bf16.msra.mxu0 %v5884_v18 }
 0x21f   :  { %2473 = vmatpush1.bf16.msra.mxu1 %v5651_v41  ;;  %2260 = vmatprep.subr.bf16.mxu0 %v5891_v5  ;;  %v4037_v41 = vld [vmem:[%s6354_s3 + $0x4e0] ss:$8 sps:$4 sm:$0xff]  }
 0x220   :  { %2246 = vmatmul.mubr.bf16.gmra.mrb[40].mxu0 %v5452_v57  ;;  %2474 = vmatprep.subr.bf16.mxu1 %v5658_v56  ;;  %v4042_v56 = vld [vmem:[%s6354_s3 + $0x4f4] ss:$8 sps:$4 sm:$0xff]  }
 0x221   :  { %2460 = vmatmul.mubr.bf16.gmra.mrb[64].mxu1 %v5452_v57  ;;  %2288 = vmatprep.mubr.bf16.mxu0 %v6457_v32  ;;  %v5930_v57 = vld [vmem:[%s6354_s3 + $0x440] ss:$8 sps:$4 sm:$0xff]  }
 0x222   :  { %2261 = vmatpush1.bf16.msra.mxu0 %v5898_v4  ;;  %2502 = vmatprep.mubr.bf16.mxu1 %v6457_v32 }
 0x223   :  { %2475 = vmatpush1.bf16.msra.mxu1 %v5666_v27  ;;  %2262 = vmatprep.subr.bf16.mxu0 %v5905_v47  ;;  %v4040_v27 = vld [vmem:[%s6354_s3 + $0x4f0] ss:$8 sps:$4 sm:$0xff]  }
 0x224   :  { %2476 = vmatprep.subr.bf16.mxu1 %v5674_v39  ;;  %v6458_v39 = vld [vmem:[#allocation4_spill] sm:$0xff] }
 0x226   :  { %2263 = vmatpush1.bf16.msra.mxu0 %v5916_v45 }
 0x227   :  { %2477 = vmatpush1.bf16.msra.mxu1 %v5683_v30  ;;  %2264 = vmatprep.subr.bf16.mxu0 %v5923_v33  ;;  %v6460_v30 = vld [vmem:[#allocation8_spill] sm:$0xff] }
 0x228   :  { %2478 = vmatprep.subr.bf16.mxu1 %v5690_v14  ;;  %v4045_v14 = vld [vmem:[%s6356_s5 + $0x4] ss:$8 sps:$4 sm:$0xff]  }
 0x22a   :  { %2265 = vmatpush1.bf16.msra.mxu0 %v5930_v57 }
 0x22b   :  { %2479 = vmatpush1.bf16.msra.mxu1 %v5698_v44  ;;  %2266 = vmatprep.subr.bf16.mxu0 %v5937_v52  ;;  %v4048_v44 = vld [vmem:[%s6356_s5 + $0x14] ss:$8 sps:$4 sm:$0xff]  }
 0x22c   :  { %2480 = vmatprep.subr.bf16.mxu1 %v5705_v1  ;;  %v4054_v1 = vld [vmem:[%s6356_s5 + $0x34] ss:$8 sps:$4 sm:$0xff]  }
 0x22e   :  { %2267 = vmatpush1.bf16.msra.mxu0 %v5944_v34 }
 0x22f   :  { %2481 = vmatpush1.bf16.msra.mxu1 %v5712_v20  ;;  %2268 = vmatprep.subr.bf16.mxu0 %v5951_v37  ;;  %v4052_v20 = vld [vmem:[%s6356_s5 + $0x30] ss:$8 sps:$4 sm:$0xff]  }
 0x230   :  { %2482 = vmatprep.subr.bf16.mxu1 %v5719_v55  ;;  %v4057_v55 = vld [vmem:[%s6356_s5 + $0x44] ss:$8 sps:$4 sm:$0xff]  }
 0x232   :  { %2269 = vmatpush1.bf16.msra.mxu0 %v5958_v19 }
 0x233   :  { %2483 = vmatpush1.bf16.msra.mxu1 %v5726_v58  ;;  %2270 = vmatprep.subr.bf16.mxu0 %v5965_v40  ;;  %v4055_v58 = vld [vmem:[%s6356_s5 + $0x40] ss:$8 sps:$4 sm:$0xff]  }
 0x234   :  { %2484 = vmatprep.subr.bf16.mxu1 %v5733_v35  ;;  %v4060_v35 = vld [vmem:[%s6356_s5 + $0x54] ss:$8 sps:$4 sm:$0xff]  }
 0x236   :  { %2271 = vmatpush1.bf16.msra.mxu0 %v5972_v2 }
 0x237   :  { %2485 = vmatpush1.bf16.msra.mxu1 %v5740_v0  ;;  %2272 = vmatprep.subr.bf16.mxu0 %v5979_v38  ;;  %v4058_v0 = vld [vmem:[%s6356_s5 + $0x50] ss:$8 sps:$4 sm:$0xff]  }
 0x238   :  { %2486 = vmatprep.subr.bf16.mxu1 %v5747_v54  ;;  %v4063_v54 = vld [vmem:[%s6356_s5 + $0x64] ss:$8 sps:$4 sm:$0xff]  }
 0x23a   :  { %2273 = vmatpush1.bf16.msra.mxu0 %v5986_v53 }
 0x23b   :  { %2487 = vmatpush1.bf16.msra.mxu1 %v5754_v7  ;;  %2274 = vmatprep.subr.bf16.mxu0 %v5993_v15  ;;  %v4061_v7 = vld [vmem:[%s6356_s5 + $0x60] ss:$8 sps:$4 sm:$0xff]  }
 0x23c   :  { %2488 = vmatprep.subr.bf16.mxu1 %v5761_v51  ;;  %v4066_v51 = vld [vmem:[%s6356_s5 + $0x74] ss:$8 sps:$4 sm:$0xff]  }
 0x23e   :  { %2275 = vmatpush1.bf16.msra.mxu0 %v6000_v23 }
 0x23f   :  { %2489 = vmatpush1.bf16.msra.mxu1 %v5768_v61  ;;  %2276 = vmatprep.subr.bf16.mxu0 %v6007_v17  ;;  %v4064_v61 = vld [vmem:[%s6356_s5 + $0x70] ss:$8 sps:$4 sm:$0xff]  }
 0x240   :  { %2490 = vmatprep.subr.bf16.mxu1 %v5775_v43  ;;  %v4069_v43 = vld [vmem:[%s6356_s5 + $0x84] ss:$8 sps:$4 sm:$0xff]  }
 0x242   :  { %2277 = vmatpush1.bf16.msra.mxu0 %v6014_v59 }
 0x243   :  { %2491 = vmatpush1.bf16.msra.mxu1 %v5782_v24  ;;  %2278 = vmatprep.subr.bf16.mxu0 %v4030_v16  ;;  %v4067_v24 = vld [vmem:[%s6356_s5 + $0x80] ss:$8 sps:$4 sm:$0xff]  }
 0x244   :  { %2492 = vmatprep.subr.bf16.mxu1 %v5789_v50  ;;  %v4072_v50 = vld [vmem:[%s6356_s5 + $0x94] ss:$8 sps:$4 sm:$0xff]  }
 0x246   :  { %2279 = vmatpush1.bf16.msra.mxu0 %v4028_v25 }
 0x247   :  { %2493 = vmatpush1.bf16.msra.mxu1 %v5796_v28  ;;  %2280 = vmatprep.subr.bf16.mxu0 %v4033_v22  ;;  %v4070_v28 = vld [vmem:[%s6356_s5 + $0x90] ss:$8 sps:$4 sm:$0xff]  }
 0x248   :  { %2494 = vmatprep.subr.bf16.mxu1 %v5803_v8  ;;  %v4075_v8 = vld [vmem:[%s6356_s5 + $0xa4] ss:$8 sps:$4 sm:$0xff]  }
 0x24a   :  { %2281 = vmatpush1.bf16.msra.mxu0 %v4031_v12 }
 0x24b   :  { %2495 = vmatpush1.bf16.msra.mxu1 %v5810_v49  ;;  %2282 = vmatprep.subr.bf16.mxu0 %v4036_v26  ;;  %v4073_v49 = vld [vmem:[%s6356_s5 + $0xa0] ss:$8 sps:$4 sm:$0xff]  }
 0x24c   :  { %2496 = vmatprep.subr.bf16.mxu1 %v5817_v11  ;;  %v4078_v11 = vld [vmem:[%s6356_s5 + $0xb4] ss:$8 sps:$4 sm:$0xff]  }
 0x24e   :  { %2283 = vmatpush1.bf16.msra.mxu0 %v4034_v6 }
 0x24f   :  { %2497 = vmatpush1.bf16.msra.mxu1 %v5824_v46  ;;  %2284 = vmatprep.subr.bf16.mxu0 %v4039_v62  ;;  %v4076_v46 = vld [vmem:[%s6356_s5 + $0xb0] ss:$8 sps:$4 sm:$0xff]  }
 0x250   :  { %2498 = vmatprep.subr.bf16.mxu1 %v5831_v9  ;;  %v4081_v9 = vld [vmem:[%s6356_s5 + $0xc4] ss:$8 sps:$4 sm:$0xff]  }
 0x252   :  { %2285 = vmatpush1.bf16.msra.mxu0 %v4037_v41 }
 0x253   :  { %2499 = vmatpush1.bf16.msra.mxu1 %v5838_v60  ;;  %2286 = vmatprep.subr.bf16.mxu0 %v4042_v56  ;;  %v4079_v60 = vld [vmem:[%s6356_s5 + $0xc0] ss:$8 sps:$4 sm:$0xff]  }
 0x254   :  { %2500 = vmatprep.subr.bf16.mxu1 %v5845_v29  ;;  %v4084_v29 = vld [vmem:[%s6356_s5 + $0xd4] ss:$8 sps:$4 sm:$0xff]  }
 0x256   :  { %2287 = vmatpush1.bf16.msra.mxu0 %v4040_v27 }
 0x257   :  { %2501 = vmatpush1.bf16.msra.mxu1 %v5852_v13  ;;  %3003 = vmatprep.subr.bf16.mxu0 %v4045_v14  ;;  %v4082_v13 = vld [vmem:[%s6356_s5 + $0xd0] ss:$8 sps:$4 sm:$0xff]  }
 0x258   :  { %2523 = vmatprep.subr.bf16.mxu1 %v5859_v48  ;;  %v4087_v48 = vld [vmem:[%s6356_s5 + $0xe4] ss:$8 sps:$4 sm:$0xff]  }
 0x259   :  { %2289 = vmatmul.mubr.bf16.vlgmr.msra.gmra.mrb[36].mxu0 %v6458_v39 }
 0x25a   :  { %2503 = vmatmul.mubr.bf16.vlgmr.msra.gmra.mrb[60].mxu1 %v6458_v39  ;;  %2298 = vmatprep.mubr.bf16.mxu0 %v6459_v21  ;;  %v3539_v39 = vld [vmem:[%s6358_s4] ss:$0 sm:$0xff] }
 0x25b   :  { %2512 = vmatprep.mubr.bf16.mxu1 %v6459_v21  ;;  %2524 = vmatpush1.bf16.msra.mxu1 %v5867_v42  ;;  %v4085_v42 = vld [vmem:[%s6356_s5 + $0xe0] ss:$8 sps:$4 sm:$0xff]  }
 0x25c   :  { %2525 = vmatprep.subr.bf16.mxu1 %v5874_v63  ;;  %v4090_v63 = vld [vmem:[%s6356_s5 + $0xf4] ss:$8 sps:$4 sm:$0xff]  }
 0x25f   :  { %2526 = vmatpush1.bf16.msra.mxu1 %v5884_v18  ;;  %v4088_v18 = vld [vmem:[%s6356_s5 + $0xf0] ss:$8 sps:$4 sm:$0xff]  }
 0x260   :  { %2527 = vmatprep.subr.bf16.mxu1 %v5891_v5  ;;  %v4093_v5 = vld [vmem:[%s6356_s5 + $0x104] ss:$8 sps:$4 sm:$0xff]  }
 0x261   :  { %2299 = vmatmul.mubr.bf16.gmra.mrb[40].mxu0 %v6460_v30 }
 0x262   :  { %2513 = vmatmul.mubr.bf16.gmra.mrb[64].mxu1 %v6460_v30 }
 0x263   :  { %2528 = vmatpush1.bf16.msra.mxu1 %v5898_v4  ;;  %2555 = vmatprep.mubr.bf16.mxu1 %v5410_v36  ;;  %v4043_v36 = vld [vmem:[%s6356_s5] ss:$8 sps:$4 sm:$0xff]  }
 0x264   :  { %2529 = vmatprep.subr.bf16.mxu1 %v5905_v47  ;;  %3004 = vmatpush1.bf16.msra.mxu0 %v4043_v36 }
 0x265   :  { %3005 = vmatprep.subr.bf16.mxu0 %v4048_v44 }
 0x267   :  { %2530 = vmatpush1.bf16.msra.mxu1 %v5916_v45 }
 0x268   :  { %2531 = vmatprep.subr.bf16.mxu1 %v5923_v33 }
 0x26b   :  { %2532 = vmatpush1.bf16.msra.mxu1 %v5930_v57 }
 0x26c   :  { %2533 = vmatprep.subr.bf16.mxu1 %v5937_v52 }
 0x26f   :  { %2534 = vmatpush1.bf16.msra.mxu1 %v5944_v34 }
 0x270   :  { %2535 = vmatprep.subr.bf16.mxu1 %v5951_v37 }
 0x273   :  { %2536 = vmatpush1.bf16.msra.mxu1 %v5958_v19 }
 0x274   :  { %2537 = vmatprep.subr.bf16.mxu1 %v5965_v40 }
 0x277   :  { %2538 = vmatpush1.bf16.msra.mxu1 %v5972_v2 }
 0x278   :  { %2539 = vmatprep.subr.bf16.mxu1 %v5979_v38  ;;  %v4139_v38 = vld [vmem:[%s6357_s7 + $0x40] sm:$0xff]  }
 0x27b   :  { %2540 = vmatpush1.bf16.msra.mxu1 %v5986_v53  ;;  %v4140_v53 = vld [vmem:[%s6357_s7] sm:$0xff]  }
 0x27c   :  { %2541 = vmatprep.subr.bf16.mxu1 %v5993_v15  ;;  %v4141_v15 = vld [vmem:[%s6357_s7 + $0x48] sm:$0xff]  }
 0x27f   :  { %2542 = vmatpush1.bf16.msra.mxu1 %v6000_v23  ;;  %v4142_v23 = vld [vmem:[%s6357_s7 + $0x8] sm:$0xff]  }
 0x280   :  { %2543 = vmatprep.subr.bf16.mxu1 %v6007_v17  ;;  %v4143_v17 = vld [vmem:[%s6357_s7 + $0x50] sm:$0xff]  }
 0x283   :  { %2544 = vmatpush1.bf16.msra.mxu1 %v6014_v59  ;;  %v4144_v59 = vld [vmem:[%s6357_s7 + $0x10] sm:$0xff]  }
 0x284   :  { %2545 = vmatprep.subr.bf16.mxu1 %v4030_v16  ;;  %v4145_v16 = vld [vmem:[%s6357_s7 + $0x58] sm:$0xff]  }
 0x287   :  { %2546 = vmatpush1.bf16.msra.mxu1 %v4028_v25  ;;  %v4146_v25 = vld [vmem:[%s6357_s7 + $0x18] sm:$0xff]  }
 0x288   :  { %2547 = vmatprep.subr.bf16.mxu1 %v4033_v22  ;;  %v4147_v22 = vld [vmem:[%s6357_s7 + $0x60] sm:$0xff]  }
 0x28b   :  { %2548 = vmatpush1.bf16.msra.mxu1 %v4031_v12  ;;  %v4148_v12 = vld [vmem:[%s6357_s7 + $0x20] sm:$0xff]  }
 0x28c   :  { %2549 = vmatprep.subr.bf16.mxu1 %v4036_v26  ;;  %v4149_v26 = vld [vmem:[%s6357_s7 + $0x68] sm:$0xff]  }
 0x28f   :  { %2550 = vmatpush1.bf16.msra.mxu1 %v4034_v6  ;;  %v4150_v6 = vld [vmem:[%s6357_s7 + $0x28] sm:$0xff]  }
 0x290   :  { %2551 = vmatprep.subr.bf16.mxu1 %v4039_v62 }
 0x293   :  { %2552 = vmatpush1.bf16.msra.mxu1 %v4037_v41 }
 0x294   :  { %2553 = vmatprep.subr.bf16.mxu1 %v4042_v56 }
 0x297   :  { %2554 = vmatpush1.bf16.msra.mxu1 %v4040_v27 }
 0x298   :  { %3621 = vmatprep.subr.bf16.mxu1 %v4139_v38  ;;  %v4132_v38 = vld [vmem:[%s6356_s5 + $0x1d4] ss:$8 sps:$4 sm:$0xff]  }
 0x29a   :  { %2556 = vmatmul.mubr.bf16.vlgmr.msra.gmra.mrb[60].mxu1 %v5402_v10  ;;  %v4046_v10 = vld [vmem:[%s6356_s5 + $0x10] ss:$8 sps:$4 sm:$0xff]  }
 0x29b   :  { %2565 = vmatprep.mubr.bf16.mxu1 %v5467_v3  ;;  %3006 = vmatpush1.bf16.msra.mxu0 %v4046_v10  ;;  %v4049_v3 = vld [vmem:[%s6356_s5 + $0x20] ss:$8 sps:$4 sm:$0xff]  }
 0x29c   :  { %3622 = vmatpush3.bf16.msra.mxu1 %v4140_v53  ;;  %v4130_v53 = vld [vmem:[%s6356_s5 + $0x1d0] ss:$8 sps:$4 sm:$0xff]  }
 0x29d   :  { %3623 = vmatprep.subr.bf16.mxu1 %v4141_v15  ;;  %v4135_v15 = vld [vmem:[%s6356_s5 + $0x1e4] ss:$8 sps:$4 sm:$0xff]  }
 0x2a0   :  { %3624 = vmatpush3.bf16.msra.mxu1 %v4142_v23  ;;  %v4133_v23 = vld [vmem:[%s6356_s5 + $0x1e0] ss:$8 sps:$4 sm:$0xff]  }
 0x2a1   :  { %3625 = vmatprep.subr.bf16.mxu1 %v4143_v17  ;;  %v4138_v17 = vld [vmem:[%s6356_s5 + $0x1f4] ss:$8 sps:$4 sm:$0xff]  }
 0x2a2   :  { %2566 = vmatmul.mubr.bf16.gmra.mrb[64].mxu1 %v5458_v31  ;;  %v4051_v31 = vld [vmem:[%s6356_s5 + $0x24] ss:$8 sps:$4 sm:$0xff]  }
 0x2a3   :  { %3007 = vmatprep.subr.bf16.mxu0 %v4051_v31 }
 0x2a4   :  { %3008 = vmatpush1.bf16.msra.mxu0 %v4049_v3  ;;  %3626 = vmatpush3.bf16.msra.mxu1 %v4144_v59  ;;  %v4136_v59 = vld [vmem:[%s6356_s5 + $0x1f0] ss:$8 sps:$4 sm:$0xff]  }
 0x2a5   :  { %3009 = vmatprep.subr.bf16.mxu0 %v4054_v1  ;;  %3627 = vmatprep.subr.bf16.mxu1 %v4145_v16 }
 0x2a8   :  { %3010 = vmatpush1.bf16.msra.mxu0 %v4052_v20  ;;  %3628 = vmatpush3.bf16.msra.mxu1 %v4146_v25 }
 0x2a9   :  { %3011 = vmatprep.subr.bf16.mxu0 %v4057_v55  ;;  %3629 = vmatprep.subr.bf16.mxu1 %v4147_v22  ;;  %v4151_v22 = vld [vmem:[%s6357_s7 + $0x70] sm:$0xff]  }
 0x2ac   :  { %3012 = vmatpush1.bf16.msra.mxu0 %v4055_v58  ;;  %3630 = vmatpush3.bf16.msra.mxu1 %v4148_v12  ;;  %v4152_v12 = vld [vmem:[%s6357_s7 + $0x30] sm:$0xff]  }
 0x2ad   :  { %3013 = vmatprep.subr.bf16.mxu0 %v4060_v35  ;;  %3631 = vmatprep.subr.bf16.mxu1 %v4149_v26  ;;  %v4153_v26 = vld [vmem:[%s6357_s7 + $0x78] sm:$0xff]  }
 0x2b0   :  { %3014 = vmatpush1.bf16.msra.mxu0 %v4058_v0  ;;  %3632 = vmatpush3.bf16.msra.mxu1 %v4150_v6  ;;  %v4154_v6 = vld [vmem:[%s6357_s7 + $0x38] sm:$0xff]  }
 0x2b1   :  { %3015 = vmatprep.subr.bf16.mxu0 %v4063_v54  ;;  %3633 = vmatprep.subr.bf16.mxu1 %v4151_v22 }
 0x2b4   :  { %3016 = vmatpush1.bf16.msra.mxu0 %v4061_v7  ;;  %3634 = vmatpush3.bf16.msra.mxu1 %v4152_v12 }
 0x2b5   :  { %3017 = vmatprep.subr.bf16.mxu0 %v4066_v51  ;;  %v4091_v51 = vld [vmem:[%s6356_s5 + $0x100] ss:$8 sps:$4 sm:$0xff]   ;;  %3635 = vmatprep.subr.bf16.mxu1 %v4153_v26 }
 0x2b8   :  { %3018 = vmatpush1.bf16.msra.mxu0 %v4064_v61  ;;  %3636 = vmatpush3.bf16.msra.mxu1 %v4154_v6 }
 0x2b9   :  { %3019 = vmatprep.subr.bf16.mxu0 %v4069_v43  ;;  %v4096_v43 = vld [vmem:[%s6356_s5 + $0x114] ss:$8 sps:$4 sm:$0xff]  }
 0x2bc   :  { %3020 = vmatpush1.bf16.msra.mxu0 %v4067_v24 }
 0x2bd   :  { %3021 = vmatprep.subr.bf16.mxu0 %v4072_v50 }
 0x2c0   :  { %3022 = vmatpush1.bf16.msra.mxu0 %v4070_v28 }
 0x2c1   :  { %3023 = vmatprep.subr.bf16.mxu0 %v4075_v8  ;;  %v4094_v8 = vld [vmem:[%s6356_s5 + $0x110] ss:$8 sps:$4 sm:$0xff]  }
 0x2c4   :  { %3024 = vmatpush1.bf16.msra.mxu0 %v4073_v49  ;;  %v4099_v49 = vld [vmem:[%s6356_s5 + $0x124] ss:$8 sps:$4 sm:$0xff]  }
 0x2c5   :  { %3025 = vmatprep.subr.bf16.mxu0 %v4078_v11 }
 0x2c8   :  { %3026 = vmatpush1.bf16.msra.mxu0 %v4076_v46  ;;  %v4097_v46 = vld [vmem:[%s6356_s5 + $0x120] ss:$8 sps:$4 sm:$0xff]  }
 0x2c9   :  { %3027 = vmatprep.subr.bf16.mxu0 %v4081_v9 }
 0x2cc   :  { %3028 = vmatpush1.bf16.msra.mxu0 %v4079_v60  ;;  %v4102_v60 = vld [vmem:[%s6356_s5 + $0x134] ss:$8 sps:$4 sm:$0xff]  }
 0x2cd   :  { %3029 = vmatprep.subr.bf16.mxu0 %v4084_v29  ;;  %v4100_v29 = vld [vmem:[%s6356_s5 + $0x130] ss:$8 sps:$4 sm:$0xff]  }
 0x2d0   :  { %3030 = vmatpush1.bf16.msra.mxu0 %v4082_v13  ;;  %v4105_v13 = vld [vmem:[%s6356_s5 + $0x144] ss:$8 sps:$4 sm:$0xff]  }
 0x2d1   :  { %3031 = vmatprep.subr.bf16.mxu0 %v4087_v48  ;;  %v4103_v48 = vld [vmem:[%s6356_s5 + $0x140] ss:$8 sps:$4 sm:$0xff]  }
 0x2d4   :  { %3032 = vmatpush1.bf16.msra.mxu0 %v4085_v42  ;;  %v4108_v42 = vld [vmem:[%s6356_s5 + $0x154] ss:$8 sps:$4 sm:$0xff]  }
 0x2d5   :  { %3033 = vmatprep.subr.bf16.mxu0 %v4090_v63  ;;  %v4106_v63 = vld [vmem:[%s6356_s5 + $0x150] ss:$8 sps:$4 sm:$0xff]  }
 0x2d8   :  { %3034 = vmatpush1.bf16.msra.mxu0 %v4088_v18  ;;  %v4111_v18 = vld [vmem:[%s6356_s5 + $0x164] ss:$8 sps:$4 sm:$0xff]  }
 0x2d9   :  { %3044 = vmatprep.subr.bf16.mxu0 %v4093_v5  ;;  %v4109_v5 = vld [vmem:[%s6356_s5 + $0x160] ss:$8 sps:$4 sm:$0xff]  }
 0x32c   :  { %v2290_v4 = vpop.f32.mrb[36].mxu0 }
 0x32d   :  { %v2292_v47 = vpop.f32.mrb[37].mxu0 }
 0x32e   :  { %v2577_v32 = vmax.f32 %v2290_v4, %v2292_v47  ;;  %v2294_v45 = vpop.f32.mrb[38].mxu0  ;;  %v4114_v4 = vld [vmem:[%s6356_s5 + $0x174] ss:$8 sps:$4 sm:$0xff]   ;;  %v4112_v47 = vld [vmem:[%s6356_s5 + $0x170] ss:$8 sps:$4 sm:$0xff]  }
 0x32f   :  { %v2296_v33 = vpop.f32.mrb[39].mxu0 }
 0x330   :  { %v2578_v57 = vmax.f32 %v2294_v45, %v2296_v33  ;;  %v4115_v45 = vld [vmem:[%s6356_s5 + $0x180] ss:$8 sps:$4 sm:$0xff]   ;;  %v4120_v33 = vld [vmem:[%s6356_s5 + $0x194] ss:$8 sps:$4 sm:$0xff]  }
 0x334   :  { %v2300_v52 = vpop.f32.mrb[40].mxu0 }
 0x335   :  { %v2302_v34 = vpop.f32.mrb[41].mxu0 }
 0x336   :  { %v2579_v37 = vmax.f32 %v2300_v52, %v2302_v34  ;;  %v2304_v19 = vpop.f32.mrb[42].mxu0  ;;  %v4123_v52 = vld [vmem:[%s6356_s5 + $0x1a4] ss:$8 sps:$4 sm:$0xff]   ;;  %v4121_v34 = vld [vmem:[%s6356_s5 + $0x1a0] ss:$8 sps:$4 sm:$0xff]  }
 0x337   :  { %v2306_v40 = vpop.f32.mrb[43].mxu0 }
 0x338   :  { %v2580_v2 = vmax.f32 %v2304_v19, %v2306_v40  ;;  %v4124_v19 = vld [vmem:[%s6356_s5 + $0x1b0] ss:$8 sps:$4 sm:$0xff]   ;;  %v4129_v40 = vld [vmem:[%s6356_s5 + $0x1c4] ss:$8 sps:$4 sm:$0xff]  }
 0x36d   :  { %v2557_v62 = vpop.f32.mrb[60].mxu1 }
 0x36e   :  { %v2559_v41 = vpop.f32.mrb[61].mxu1 }
 0x36f   :  { %v2581_v56 = vmax.f32 %v2557_v62, %v2559_v41  ;;  %v2561_v27 = vpop.f32.mrb[62].mxu1  ;;  %v2671_v62 = vld [vmem:[%s6359_s6] sm:$0x3] }
 0x370   :  { %v2563_v21 = vpop.f32.mrb[63].mxu1  ;;  %v6461_v41 = vld [vmem:[#allocation2_spill] sm:$0xff] }
 0x371   :  { %v2585_v30 = vmax.f32 %v2577_v32, %v2581_v56  ;;  %v2582_v36 = vmax.f32 %v2561_v27, %v2563_v21  ;;  %v4117_v32 = vld [vmem:[%s6356_s5 + $0x184] ss:$8 sps:$4 sm:$0xff]   ;;  %v6462_v56 = vsub.s32 0, %v6461_v41 }
 0x373   :  { %v2595_v14 = vadd.f32 %v3539_v39, %v2585_v30  ;;  %v2586_v44 = vmax.f32 %v2578_v57, %v2582_v36  ;;  %v4118_v57 = vld [vmem:[%s6356_s5 + $0x190] ss:$8 sps:$4 sm:$0xff]   ;;  %v2676_v27 = vrot.slane %v2671_v62, %v6462_v56 }
 0x375   :  { %v2596_v10 = vadd.f32 %v3539_v39, %v2586_v44  ;;  %v2567_v31 = vpop.f32.mrb[64].mxu1  ;;  %v2599_v3 = vmax.f32 %v2595_v14, 0.0 }
 0x376   :  { %v2569_v1 = vpop.f32.mrb[65].mxu1 }
 0x377   :  { %v2583_v20 = vmax.f32 %v2567_v31, %v2569_v1  ;;  %v2571_v55 = vpop.f32.mrb[66].mxu1  ;;  %v2600_v58 = vmax.f32 %v2596_v10, 0.0  ;;  %v2603_v61 = vpack.c.bf16 %v2599_v3, %v2599_v3 }
 0x378   :  { %v2573_v35 = vpop.f32.mrb[67].mxu1 }
 0x379   :  { %v2587_v0 = vmax.f32 %v2579_v37, %v2583_v20  ;;  %v2584_v54 = vmax.f32 %v2571_v55, %v2573_v35  ;;  %v2604_v7 = vpack.c.bf16 %v2600_v58, %v2600_v58  ;;  %v4126_v37 = vld [vmem:[%s6356_s5 + $0x1b4] ss:$8 sps:$4 sm:$0xff]   ;;  %v3604_v35 = vld [vmem:[%s6360_s8] ss:$0 sm:$0xff] }
 0x37b   :  { %v6237_v24 = vadd.f32 %v3539_v39, %v2587_v0  ;;  %v2588_v50 = vmax.f32 %v2580_v2, %v2584_v54  ;;  %3035 = vmatprep.mubr.bf16.mxu0 %v2604_v7  ;;  %v4127_v2 = vld [vmem:[%s6356_s5 + $0x1c0] ss:$8 sps:$4 sm:$0xff]  }
 0x37c   :  { %3036 = vmatmul.mubr.bf16.vlgmr.msra.gmra.mrb[44].mxu0 %v2603_v61 }
 0x37d   :  { %v2598_v28 = vadd.f32 %v3539_v39, %v2588_v50  ;;  %3045 = vmatpush1.bf16.msra.mxu0 %v4091_v51  ;;  %v2601_v16 = vmax.f32 %v6237_v24, 0.0  ;;  %v6463_v39 = vsub.s32 1, %v6461_v41 }
 0x37e   :  { %3046 = vmatprep.subr.bf16.mxu0 %v4096_v43 }
 0x37f   :  { %v2602_v11 = vmax.f32 %v2598_v28, 0.0  ;;  %v2605_v25 = vpack.c.bf16 %v2601_v16, %v2601_v16  ;;  %v2680_v21 = vrot.slane %v2671_v62, %v6463_v39 }
 0x381   :  { %3047 = vmatpush1.bf16.msra.mxu0 %v4094_v8  ;;  %v2606_v9 = vpack.c.bf16 %v2602_v11, %v2602_v11 }
 0x382   :  { %3048 = vmatprep.subr.bf16.mxu0 %v4099_v49 }
 0x383   :  { %3076 = vmatprep.mubr.bf16.mxu0 %v2606_v9 }
 0x385   :  { %3049 = vmatpush1.bf16.msra.mxu0 %v4097_v46 }
 0x386   :  { %3050 = vmatprep.subr.bf16.mxu0 %v4102_v60 }
 0x389   :  { %3051 = vmatpush1.bf16.msra.mxu0 %v4100_v29 }
 0x38a   :  { %3052 = vmatprep.subr.bf16.mxu0 %v4105_v13 }
 0x38d   :  { %3053 = vmatpush1.bf16.msra.mxu0 %v4103_v48 }
 0x38e   :  { %3054 = vmatprep.subr.bf16.mxu0 %v4108_v42 }
 0x391   :  { %3055 = vmatpush1.bf16.msra.mxu0 %v4106_v63 }
 0x392   :  { %3056 = vmatprep.subr.bf16.mxu0 %v4111_v18 }
 0x395   :  { %3057 = vmatpush1.bf16.msra.mxu0 %v4109_v5 }
 0x396   :  { %3058 = vmatprep.subr.bf16.mxu0 %v4114_v4 }
 0x399   :  { %3059 = vmatpush1.bf16.msra.mxu0 %v4112_v47 }
 0x39a   :  { %3060 = vmatprep.subr.bf16.mxu0 %v4117_v32 }
 0x39d   :  { %3061 = vmatpush1.bf16.msra.mxu0 %v4115_v45 }
 0x39e   :  { %3062 = vmatprep.subr.bf16.mxu0 %v4120_v33 }
 0x3a1   :  { %3063 = vmatpush1.bf16.msra.mxu0 %v4118_v57 }
 0x3a2   :  { %3064 = vmatprep.subr.bf16.mxu0 %v4123_v52 }
 0x3a5   :  { %3065 = vmatpush1.bf16.msra.mxu0 %v4121_v34 }
 0x3a6   :  { %3066 = vmatprep.subr.bf16.mxu0 %v4126_v37 }
 0x3a9   :  { %3067 = vmatpush1.bf16.msra.mxu0 %v4124_v19 }
 0x3aa   :  { %3068 = vmatprep.subr.bf16.mxu0 %v4129_v40 }
 0x3ad   :  { %3069 = vmatpush1.bf16.msra.mxu0 %v4127_v2 }
 0x3ae   :  { %3070 = vmatprep.subr.bf16.mxu0 %v4132_v38 }
 0x3b1   :  { %3071 = vmatpush1.bf16.msra.mxu0 %v4130_v53 }
 0x3b2   :  { %3072 = vmatprep.subr.bf16.mxu0 %v4135_v15 }
 0x3b5   :  { %3073 = vmatpush1.bf16.msra.mxu0 %v4133_v23 }
 0x3b6   :  { %3074 = vmatprep.subr.bf16.mxu0 %v4138_v17 }
 0x3b9   :  { %3075 = vmatpush1.bf16.msra.mxu0 %v4136_v59 }
 0x3bc   :  { %3077 = vmatmul.mubr.bf16.vlgmr.msra.gmra.mrb[44].mxu0 %v2605_v25 }
 0x48f   :  { %v3078_v30 = vpop.f32.mrb[44].mxu0 }
 0x490   :  { %v3643_v36 = vadd.f32 %v3078_v30, %v2676_v27  ;;  %v3080_v14 = vpop.f32.mrb[45].mxu0 }
 0x491   :  { %v3644_v44 = vadd.f32 %v3080_v14, %v2680_v21  ;;  %v3082_v10 = vpop.f32.mrb[46].mxu0 }
 0x492   :  { %v3085_v31 = vmax.f32 %v3643_v36, 0.0  ;;  %v3083_v3 = vpop.f32.mrb[47].mxu0 }
 0x493   :  { %v3086_v1 = vmax.f32 %v3644_v44, 0.0 }
 0x494   :  { %v3087_v55 = vpack.c.bf16 %v3085_v31, %v3085_v31 }
 0x495   :  { %v3088_v20 = vpack.c.bf16 %v3086_v1, %v3086_v1 }
 0x497   :  { %3256 = vmatprep.mubr.bf16.mxu1 %v3088_v20 }
 0x498   :  { %3257 = vmatmul.mubr.bf16.vlgmr.msra.gmra.mrb[68].mxu1 %v3087_v55 }
 0x56b   :  { %v3637_v58 = vpop.f32.mrb[68].mxu1 }
 0x56c   :  { %v3638_v0 = vpop.f32.mrb[69].mxu1 }
 0x56d   :  { %v3639_v54 = vadd.f32 %v3638_v0, %v3637_v58  ;;  %v3640_v7 = vpop.f32.mrb[70].mxu1 }
 0x56e   :  { %v3641_v51 = vpop.f32.mrb[71].mxu1 }
 0x56f   :  { %v3259_v61 = vadd.f32 %v3639_v54, %v3604_v35 }
 0x571   :  { %3264 = vst [vmem:[%s6361_s9] sm:$0xff] %v3259_v61 }

</bundles_post_ra>
